<compile_context>
chip_gen: v6e
topology: v6e:2x2x1
jax: 0.10.0
libtpu: 0.0.40
codegen_flags: <defaults>
</compile_context>

<pallas_src>
import jax
import jax.numpy as jnp
import numpy as np
from jax.experimental import pallas as pl
from jax.experimental.pallas import tpu as pltpu

D_IN = 378          # true feature dim
D_PAD = 384         # padded feature dim (multiple of 128)
TB_MAX = 256        # target batch tile (M dim of every matmul)


def _round_up(n, m):
    return ((n + m - 1) // m) * m


def mlp_kernel(x_ref, w1_ref, b1_ref, w2_ref, b2_ref, w3_ref, b3_ref,
               w4_ref, b4_ref, o_ref):
    # Layers 1-3 on the MXU: bf16 operands, f32 accumulation.
    h = jnp.dot(x_ref[...], w1_ref[...], preferred_element_type=jnp.float32)
    h = jnp.maximum(h + b1_ref[...], 0.0)
    h = jnp.dot(h.astype(jnp.bfloat16), w2_ref[...],
                preferred_element_type=jnp.float32)
    h = jnp.maximum(h + b2_ref[...], 0.0)
    h = jnp.dot(h.astype(jnp.bfloat16), w3_ref[...],
                preferred_element_type=jnp.float32)
    h = jnp.maximum(h + b3_ref[...], 0.0)
    # Layer 4 (378 -> 1) on the VPU/XLU: multiply by the single true weight row
    # (kept in f32) and reduce across lanes.  Avoids a 127/128-wasted MXU pass
    # and keeps the stored output at 1 column instead of 128.
    o = jnp.sum(h * w4_ref[...], axis=-1, keepdims=True) + b4_ref[...]
    o_ref[...] = o.astype(o_ref.dtype)


def _pad_w_bf16(w, rows, cols):
    p = jnp.zeros((rows, cols), jnp.float32).at[:w.shape[0], :w.shape[1]].set(w)
    return p.astype(jnp.bfloat16)


def _pad_b(b, cols):
    return jnp.zeros((1, cols), jnp.float32).at[0, :b.shape[0]].set(b)


def net_forward(x, params, tb_max=TB_MAX):
    """x: (B, 378) float32  ->  (B, 1) float32  (matches PyTorch Net.forward)."""
    (w1, b1), (w2, b2), (w3, b3), (w4, b4) = params
    B = x.shape[0]
    TB = min(tb_max, _round_up(max(B, 1), 8))   # sublane-aligned batch tile
    B_pad = _round_up(B, TB)

    # Glue: zero-pad activations / params to TPU-friendly shapes (exact semantics).
    x_p = jnp.zeros((B_pad, D_PAD), jnp.float32).at[:B, :D_IN].set(x)
    x_p = x_p.astype(jnp.bfloat16)
    w1_p, b1_p = _pad_w_bf16(w1, D_PAD, D_PAD), _pad_b(b1, D_PAD)
    w2_p, b2_p = _pad_w_bf16(w2, D_PAD, D_PAD), _pad_b(b2, D_PAD)
    w3_p, b3_p = _pad_w_bf16(w3, D_PAD, D_PAD), _pad_b(b3, D_PAD)
    w4_row = jnp.zeros((1, D_PAD), jnp.float32).at[0, :D_IN].set(w4[:, 0])  # f32 row
    b4_p = jnp.reshape(b4, (1, 1)).astype(jnp.float32)

    grid = (B_pad // TB,)
    full = lambda shape: pl.BlockSpec(shape, lambda i: (0, 0))  # grid-invariant

    weight_bytes = 3 * D_PAD * D_PAD * 2 + 3 * D_PAD * 4 + D_PAD * 4 + 4
    cost = pl.CostEstimate(
        flops=2 * B_pad * (3 * D_PAD * D_PAD + D_PAD),
        transcendentals=0,
        bytes_accessed=B_pad * D_PAD * 2 + B_pad * 4 + weight_bytes)

    out_p = pl.pallas_call(
        mlp_kernel,
        out_shape=jax.ShapeDtypeStruct((B_pad, 1), jnp.float32),
        grid_spec=pltpu.PrefetchScalarGridSpec(
            num_scalar_prefetch=0,
            grid=grid,
            in_specs=[
                pl.BlockSpec((TB, D_PAD), lambda i: (i, 0)),   # x tile (bf16)
                full((D_PAD, D_PAD)), full((1, D_PAD)),        # layer 1
                full((D_PAD, D_PAD)), full((1, D_PAD)),        # layer 2
                full((D_PAD, D_PAD)), full((1, D_PAD)),        # layer 3
                full((1, D_PAD)),     full((1, 1)),            # layer 4 (row + bias)
            ],
            out_specs=pl.BlockSpec((TB, 1), lambda i: (i, 0)),
        ),
        compiler_params=pltpu.CompilerParams(
            dimension_semantics=("parallel",)),
        cost_estimate=cost,
    )(x_p, w1_p, b1_p, w2_p, b2_p, w3_p, b3_p, w4_row, b4_p)

    return out_p[:B, :]


def init_params(key):
    """Deterministic init mimicking PyTorch nn.Linear default (U(-1/sqrt(fan_in), ..))."""
    dims = [(D_IN, D_IN), (D_IN, D_IN), (D_IN, D_IN), (D_IN, 1)]
    params = []
    for (fan_in, fan_out) in dims:
        key, kw, kb = jax.random.split(key, 3)
        bound = 1.0 / np.sqrt(fan_in)
        # stored as (in, out) so forward is x @ W + b
        w = jax.random.uniform(kw, (fan_in, fan_out), jnp.float32, -bound, bound)
        b = jax.random.uniform(kb, (fan_out,), jnp.float32, -bound, bound)
        params.append((w, b))
    return params


def net_reference(x, params, mimic_kernel=False):
    """Pure-JAX reference.  mimic_kernel=True applies the same bf16 casts as the kernel."""
    (w1, b1), (w2, b2), (w3, b3), (w4, b4) = params
    h = x
    for (w, b) in ((w1, b1), (w2, b2), (w3, b3)):
        if mimic_kernel:
            h = jnp.dot(h.astype(jnp.bfloat16), w.astype(jnp.bfloat16),
                        preferred_element_type=jnp.float32)
        else:
            h = jnp.dot(h, w)
        h = jnp.maximum(h + b, 0.0)
    return jnp.dot(h, w4) + b4   # final layer in f32 (kernel does the same)


if __name__ == "__main__":
    key = jax.random.PRNGKey(0)
    kp, kx = jax.random.split(key)
    params = init_params(kp)

    batch = 20   # small demo batch, deliberately not a multiple of 8 (tests padding)
    x = jax.random.normal(kx, (batch, D_IN), jnp.float32)

    # Default path (single tile for this small batch).
    out = jax.block_until_ready(net_forward(x, params))
    # Forced small tile -> multi-step grid, exercises the pipelined/tiled path.
    out_tiled = jax.block_until_ready(net_forward(x, params, tb_max=8))

    ref_mimic = np.asarray(net_reference(x, params, mimic_kernel=True))
    ref_f32 = np.asarray(net_reference(x, params, mimic_kernel=False))

    for o in (out, out_tiled):
        o = np.asarray(o)
        assert o.shape == (batch, 1)
        np.testing.assert_allclose(o, ref_mimic, rtol=1e-2, atol=1e-2)
        np.testing.assert_allclose(o, ref_f32, rtol=5e-2, atol=5e-2)

    print("KERNEL_OK")
</pallas_src>

<mosaic_0001>
module attributes {stable_mosaic.version = 11 : i64} {
  func.func @mlp_kernel(%arg0: i32, %arg1: memref<24x384xbf16, #tpu.memory_space<vmem>>, %arg2: memref<384x384xbf16, #tpu.memory_space<vmem>>, %arg3: memref<1x384xf32, #tpu.memory_space<vmem>>, %arg4: memref<384x384xbf16, #tpu.memory_space<vmem>>, %arg5: memref<1x384xf32, #tpu.memory_space<vmem>>, %arg6: memref<384x384xbf16, #tpu.memory_space<vmem>>, %arg7: memref<1x384xf32, #tpu.memory_space<vmem>>, %arg8: memref<1x384xf32, #tpu.memory_space<vmem>>, %arg9: memref<1x1xf32, #tpu.memory_space<vmem>>, %arg10: memref<24x1xf32, #tpu.memory_space<vmem>>) attributes {dimension_semantics = [#tpu.dimension_semantics<parallel>], iteration_bounds = array<i64: 1>, scalar_prefetch = 0 : i64, scratch_operands = 0 : i64, tpu.core_type = #tpu.core_type<tc>, window_params = [{transform_indices = @transform_0, window_bounds = array<i64: 24, 384>}, {pipeline_mode = #tpu.pipeline_mode<synchronous>, transform_indices = @transform_1, window_bounds = array<i64: 384, 384>}, {pipeline_mode = #tpu.pipeline_mode<synchronous>, transform_indices = @transform_2, window_bounds = array<i64: 1, 384>}, {pipeline_mode = #tpu.pipeline_mode<synchronous>, transform_indices = @transform_3, window_bounds = array<i64: 384, 384>}, {pipeline_mode = #tpu.pipeline_mode<synchronous>, transform_indices = @transform_4, window_bounds = array<i64: 1, 384>}, {pipeline_mode = #tpu.pipeline_mode<synchronous>, transform_indices = @transform_5, window_bounds = array<i64: 384, 384>}, {pipeline_mode = #tpu.pipeline_mode<synchronous>, transform_indices = @transform_6, window_bounds = array<i64: 1, 384>}, {pipeline_mode = #tpu.pipeline_mode<synchronous>, transform_indices = @transform_7, window_bounds = array<i64: 1, 384>}, {pipeline_mode = #tpu.pipeline_mode<synchronous>, transform_indices = @transform_8, window_bounds = array<i64: 1, 1>}, {transform_indices = @transform_9, window_bounds = array<i64: 24, 1>}]} {
    %c0 = arith.constant 0 : index
    %c0_0 = arith.constant 0 : index
    %0 = vector.load %arg1[%c0, %c0_0] : memref<24x384xbf16, #tpu.memory_space<vmem>>, vector<24x384xbf16>
    %c0_1 = arith.constant 0 : index
    %c0_2 = arith.constant 0 : index
    %1 = vector.load %arg2[%c0_1, %c0_2] : memref<384x384xbf16, #tpu.memory_space<vmem>>, vector<384x384xbf16>
    %cst = arith.constant dense<0.000000e+00> : vector<24x384xf32>
    %2 = tpu.matmul %0, %1, %cst {dimension_numbers = #tpu.dot_dimension_numbers<[1], [0], [0], [1], [0, 0, 1, 1], [], []>} : vector<24x384xbf16>, vector<384x384xbf16>, vector<24x384xf32> -> vector<24x384xf32>
    %c0_3 = arith.constant 0 : index
    %c0_4 = arith.constant 0 : index
    %3 = vector.load %arg3[%c0_3, %c0_4] : memref<1x384xf32, #tpu.memory_space<vmem>>, vector<1x384xf32>
    %4 = vector.broadcast %3 : vector<1x384xf32> to vector<24x384xf32>
    %5 = arith.addf %2, %4 : vector<24x384xf32>
    %cst_5 = arith.constant 0.000000e+00 : f32
    %6 = vector.broadcast %cst_5 : f32 to vector<24x384xf32>
    %7 = arith.maximumf %5, %6 : vector<24x384xf32>
    %8 = arith.truncf %7 : vector<24x384xf32> to vector<24x384xbf16>
    %c0_6 = arith.constant 0 : index
    %c0_7 = arith.constant 0 : index
    %9 = vector.load %arg4[%c0_6, %c0_7] : memref<384x384xbf16, #tpu.memory_space<vmem>>, vector<384x384xbf16>
    %cst_8 = arith.constant dense<0.000000e+00> : vector<24x384xf32>
    %10 = tpu.matmul %8, %9, %cst_8 {dimension_numbers = #tpu.dot_dimension_numbers<[1], [0], [0], [1], [0, 0, 1, 1], [], []>} : vector<24x384xbf16>, vector<384x384xbf16>, vector<24x384xf32> -> vector<24x384xf32>
    %c0_9 = arith.constant 0 : index
    %c0_10 = arith.constant 0 : index
    %11 = vector.load %arg5[%c0_9, %c0_10] : memref<1x384xf32, #tpu.memory_space<vmem>>, vector<1x384xf32>
    %12 = vector.broadcast %11 : vector<1x384xf32> to vector<24x384xf32>
    %13 = arith.addf %10, %12 : vector<24x384xf32>
    %cst_11 = arith.constant 0.000000e+00 : f32
    %14 = vector.broadcast %cst_11 : f32 to vector<24x384xf32>
    %15 = arith.maximumf %13, %14 : vector<24x384xf32>
    %16 = arith.truncf %15 : vector<24x384xf32> to vector<24x384xbf16>
    %c0_12 = arith.constant 0 : index
    %c0_13 = arith.constant 0 : index
    %17 = vector.load %arg6[%c0_12, %c0_13] : memref<384x384xbf16, #tpu.memory_space<vmem>>, vector<384x384xbf16>
    %cst_14 = arith.constant dense<0.000000e+00> : vector<24x384xf32>
    %18 = tpu.matmul %16, %17, %cst_14 {dimension_numbers = #tpu.dot_dimension_numbers<[1], [0], [0], [1], [0, 0, 1, 1], [], []>} : vector<24x384xbf16>, vector<384x384xbf16>, vector<24x384xf32> -> vector<24x384xf32>
    %c0_15 = arith.constant 0 : index
    %c0_16 = arith.constant 0 : index
    %19 = vector.load %arg7[%c0_15, %c0_16] : memref<1x384xf32, #tpu.memory_space<vmem>>, vector<1x384xf32>
    %20 = vector.broadcast %19 : vector<1x384xf32> to vector<24x384xf32>
    %21 = arith.addf %18, %20 : vector<24x384xf32>
    %cst_17 = arith.constant 0.000000e+00 : f32
    %22 = vector.broadcast %cst_17 : f32 to vector<24x384xf32>
    %23 = arith.maximumf %21, %22 : vector<24x384xf32>
    %c0_18 = arith.constant 0 : index
    %c0_19 = arith.constant 0 : index
    %24 = vector.load %arg8[%c0_18, %c0_19] : memref<1x384xf32, #tpu.memory_space<vmem>>, vector<1x384xf32>
    %25 = vector.broadcast %24 : vector<1x384xf32> to vector<24x384xf32>
    %26 = arith.mulf %23, %25 : vector<24x384xf32>
    %cst_20 = arith.constant dense<0.000000e+00> : vector<24xf32>
    %27 = vector.multi_reduction <add>, %26, %cst_20 [1] : vector<24x384xf32> to vector<24xf32>
    %28 = vector.shape_cast %27 : vector<24xf32> to vector<24x1xf32>
    %c0_21 = arith.constant 0 : index
    %c0_22 = arith.constant 0 : index
    %29 = vector.load %arg9[%c0_21, %c0_22] : memref<1x1xf32, #tpu.memory_space<vmem>>, vector<1x1xf32>
    %30 = vector.broadcast %29 : vector<1x1xf32> to vector<24x1xf32>
    %31 = arith.addf %28, %30 : vector<24x1xf32>
    %c0_23 = arith.constant 0 : index
    %c0_24 = arith.constant 0 : index
    %32 = vector.load %arg10[%c0_23, %c0_24] : memref<24x1xf32, #tpu.memory_space<vmem>>, vector<24x1xf32>
    tpu.vector_store %arg10[%c0_23, %c0_24], %31 {strides = array<i32>} : memref<24x1xf32, #tpu.memory_space<vmem>>, vector<24x1xf32>,
    return
  }
  func.func @transform_0(%arg0: i32) -> (i32, i32) {
    %c0_i32 = arith.constant 0 : i32
    %c0_i32_0 = arith.constant 0 : i32
    return %arg0, %c0_i32 : i32, i32
  }
  func.func @transform_1(%arg0: i32) -> (i32, i32) {
    %c0_i32 = arith.constant 0 : i32
    %c0_i32_0 = arith.constant 0 : i32
    %c0_i32_1 = arith.constant 0 : i32
    return %c0_i32, %c0_i32_0 : i32, i32
  }
  func.func @transform_2(%arg0: i32) -> (i32, i32) {
    %c0_i32 = arith.constant 0 : i32
    %c0_i32_0 = arith.constant 0 : i32
    %c0_i32_1 = arith.constant 0 : i32
    return %c0_i32, %c0_i32_0 : i32, i32
  }
  func.func @transform_3(%arg0: i32) -> (i32, i32) {
    %c0_i32 = arith.constant 0 : i32
    %c0_i32_0 = arith.constant 0 : i32
    %c0_i32_1 = arith.constant 0 : i32
    return %c0_i32, %c0_i32_0 : i32, i32
  }
  func.func @transform_4(%arg0: i32) -> (i32, i32) {
    %c0_i32 = arith.constant 0 : i32
    %c0_i32_0 = arith.constant 0 : i32
    %c0_i32_1 = arith.constant 0 : i32
    return %c0_i32, %c0_i32_0 : i32, i32
  }
  func.func @transform_5(%arg0: i32) -> (i32, i32) {
    %c0_i32 = arith.constant 0 : i32
    %c0_i32_0 = arith.constant 0 : i32
    %c0_i32_1 = arith.constant 0 : i32
    return %c0_i32, %c0_i32_0 : i32, i32
  }
  func.func @transform_6(%arg0: i32) -> (i32, i32) {
    %c0_i32 = arith.constant 0 : i32
    %c0_i32_0 = arith.constant 0 : i32
    %c0_i32_1 = arith.constant 0 : i32
    return %c0_i32, %c0_i32_0 : i32, i32
  }
  func.func @transform_7(%arg0: i32) -> (i32, i32) {
    %c0_i32 = arith.constant 0 : i32
    %c0_i32_0 = arith.constant 0 : i32
    %c0_i32_1 = arith.constant 0 : i32
    return %c0_i32, %c0_i32_0 : i32, i32
  }
  func.func @transform_8(%arg0: i32) -> (i32, i32) {
    %c0_i32 = arith.constant 0 : i32
    %c0_i32_0 = arith.constant 0 : i32
    %c0_i32_1 = arith.constant 0 : i32
    return %c0_i32, %c0_i32_0 : i32, i32
  }
  func.func @transform_9(%arg0: i32) -> (i32, i32) {
    %c0_i32 = arith.constant 0 : i32
    %c0_i32_0 = arith.constant 0 : i32
    return %arg0, %c0_i32 : i32, i32
  }
}

</mosaic_0001>

<bundles_post_ra>
// kernel: tpu_custom_call.1
= control target key start
LH: loop header
LB: loop body
LE: loop exit
PB: predicated region body
PF: predicated region fallthrough
CT: control target
= control target key end

     0   :  { %s3271_s0 = inlined_call_operand.hbm [shape: bf16[24,384], index: 0, kind: input, shape index: {}]   ;;  %s3272_s1 = inlined_call_operand.hbm [shape: bf16[384,384], index: 1, kind: input, shape index: {}]   ;;  %s3273_s2 = inlined_call_operand.vmem [shape: f32[1,384], index: 2, kind: input, shape index: {}]   ;;  %s3274_s3 = inlined_call_operand.hbm [shape: bf16[384,384], index: 3, kind: input, shape index: {}]   ;;  %s3275_s4 = inlined_call_operand.vmem [shape: f32[1,384], index: 4, kind: input, shape index: {}]   ;;  %s3276_s5 = inlined_call_operand.hbm [shape: bf16[384,384], index: 5, kind: input, shape index: {}]   ;;  %s3277_s6 = inlined_call_operand.vmem [shape: f32[1,384], index: 6, kind: input, shape index: {}]   ;;  %s3278_s7 = inlined_call_operand.vmem [shape: f32[1,384], index: 7, kind: input, shape index: {}]   ;;  %s3279_s8 = inlined_call_operand.<no memory space> [shape: f32[1,1], index: 8, kind: input, shape index: {}]   ;;  %s3280_s9 = inlined_call_operand.vmem [shape: f32[24,1], index: 9, kind: output, shape index: {}]  }
   0x1   :  { %v14_v0 = vstv %s3279_s8 }
   0x2   :  { %15 = vst [vmem:[#allocation2] sm:$0x1] %v14_v0 }
   0x3   :  { %16 = vsyncpa [#allocation4], 0 }
   0x4   :  { %17 = vsyncpa [#allocation6], 0 }
   0x5   :  { %18 = vsyncpa [#allocation9], 0  ;;  %s3091_s11 = smov [#allocation5]   ;;  %s3092_s13 = smov [#allocation3]  }
   0x6   :  { %s36_s12 = sshll.u32 %s3091_s11, 4  ;;  %s24_s14 = sshll.u32 %s3092_s13, 4  ;;  %s37_s12 = int_to_ptr.vmem [resolvable:$true] %s36_s12  ;;  %s25_s14 = int_to_ptr.vmem [resolvable:$true] %s24_s14 }
   0x7   :  { %s3013_s15 = scalar_lea.vmem %s37_s12, 9216  ;;  %p3018_p1 = scmp.lt.s32.totalorder %s37_s12, %s37_s12 }
   0x8   :  { %p3014_p0 = scmp.ne.s32.totalorder %s37_s12, %s3013_s15  ;;  %p3019_p2 = scmp.lt.s32.totalorder %s3013_s15, %s3013_s15 }
   0xa   :  { %p3020_p3 = por %p3019_p2, %p3018_p1 }
   0xc   :  { %p3021_p4 = pnand %p3020_p3, %p3014_p0 }
   0xe   :  { %3024 = shalt.err (!%p3021_p4)
}
   0xf   :  { %s3093_s16 = smov 192   ;;  %s3094_s17 = smov 12  }
  0x10   :  { %42 = dma.hbm_to_vmem [thread:$0]  %s3272_s1, 9216, %s37_s12, [#allocation6], %s3093_s16, %s3093_s16, %s3094_s17  }
  0x11   :  { %s3033_s19 = scalar_lea.vmem %s25_s14, 576  ;;  %p3038_p6 = scmp.lt.s32.totalorder %s25_s14, %s25_s14 }
  0x12   :  { %p3034_p5 = scmp.ne.s32.totalorder %s25_s14, %s3033_s19  ;;  %p3039_p7 = scmp.lt.s32.totalorder %s3033_s19, %s3033_s19 }
  0x14   :  { %p3040_p8 = por %p3039_p7, %p3038_p6 }
  0x16   :  { %p3041_p9 = pnand %p3040_p8, %p3034_p5 }
  0x18   :  { %3044 = shalt.err (!%p3041_p9)
}
  0x19   :  { %30 = dma.hbm_to_vmem [thread:$0]  %s3271_s0, 576, %s25_s14, [#allocation4], %s3093_s16, %s3093_s16, %s3094_s17  }
  0x1a   :  { %s3095_s22 = smov [#allocation7]   ;;  %s3096_s24 = smov [#allocation8]  }
  0x1b   :  { %s50_s23 = sshll.u32 %s3095_s22, 4  ;;  %s64_s25 = sshll.u32 %s3096_s24, 4  ;;  %s51_s23 = int_to_ptr.vmem [resolvable:$true] %s50_s23  ;;  %s65_s25 = int_to_ptr.vmem [resolvable:$true] %s64_s25 }
  0x1c   :  { %s3053_s1 = scalar_lea.vmem %s51_s23, 9216  ;;  %p3058_p11 = scmp.lt.s32.totalorder %s51_s23, %s51_s23 }
  0x1d   :  { %p3054_p10 = scmp.ne.s32.totalorder %s51_s23, %s3053_s1  ;;  %p3059_p12 = scmp.lt.s32.totalorder %s3053_s1, %s3053_s1 }
  0x1f   :  { %p3060_p13 = por %p3059_p12, %p3058_p11 }
  0x21   :  { %p3061_p0 = pnand %p3060_p13, %p3054_p10 }
  0x23   :  { %3064 = shalt.err (!%p3061_p0)
}
  0x24   :  { %56 = dma.hbm_to_vmem [thread:$0]  %s3274_s3, 9216, %s51_s23, [#allocation6], %s3093_s16, %s3093_s16, %s3094_s17  }
  0x25   :  { %s3073_s0 = scalar_lea.vmem %s65_s25, 9216  ;;  %p3078_p2 = scmp.lt.s32.totalorder %s65_s25, %s65_s25 }
  0x26   :  { %p3074_p1 = scmp.ne.s32.totalorder %s65_s25, %s3073_s0  ;;  %p3079_p3 = scmp.lt.s32.totalorder %s3073_s0, %s3073_s0 }
  0x28   :  { %p3080_p4 = por %p3079_p3, %p3078_p2 }
  0x2a   :  { %p3081_p5 = pnand %p3080_p4, %p3074_p1 }
  0x2c   :  { %3084 = shalt.err (!%p3081_p5)
}
  0x2d   :  { %70 = dma.hbm_to_vmem [thread:$0]  %s3276_s5, 9216, %s65_s25, [#allocation9], %s3093_s16, %s3093_s16, %s3094_s17  }
  0x2e   :  { %3085 = dma.done.wait [#allocation4], 576  }
  0x2f   :  { %3086 = vsyncadd [#allocation4], 4294966720 }
  0x30   :  { %3087 = dma.done.wait [#allocation6], 18432  }
  0x31   :  { %3088 = vsyncadd [#allocation6], 4294948864 }
  0x32   :  { %3089 = dma.done.wait [#allocation9], 9216  }
  0x33   :  { %3090 = vsyncadd [#allocation9], 4294958080  ;;  %v3097_v1 = vmov 0   ;;  %v2710_v2 = vld [vmem:[#allocation5 + $0xac] ss:$12 sps:$4 sm:$0xff]   ;;  %vm2295_vm0 = vcmask 7168  }
  0x34   :  { %703 = vmatprep.mubr.bf16.mxu1 %v3097_v1  ;;  %v2712_v3 = vld [vmem:[#allocation5 + $0xa8] ss:$12 sps:$4 sm:$0xff]   ;;  %620 = vmatprep.subr.bf16.mxu0 %v2710_v2  ;;  %v2715_v5 = vld [vmem:[#allocation5 + $0x90] ss:$12 sps:$4 sm:$0xff]   ;;  %v2718_v7 = vld [vmem:[#allocation5 + $0x78] ss:$12 sps:$4 sm:$0xff]  }
  0x35   :  { %v2713_v4 = vld [vmem:[#allocation5 + $0x94] ss:$12 sps:$4 sm:$0xff]   ;;  %621 = vmatpush1.bf16.msra.mxu0 %v2712_v3  ;;  %v2716_v6 = vld [vmem:[#allocation5 + $0x7c] ss:$12 sps:$4 sm:$0xff]   ;;  %v2725_v8 = vld [vmem:[#allocation5 + $0x22c] ss:$12 sps:$4 sm:$0xff]  }
  0x36   :  { %622 = vmatprep.subr.bf16.mxu0 %v2713_v4  ;;  %v2727_v9 = vld [vmem:[#allocation5 + $0x228] ss:$12 sps:$4 sm:$0xff]   ;;  %v2719_v10 = vld [vmem:[#allocation5 + $0x64] ss:$12 sps:$4 sm:$0xff]   ;;  %671 = vmatprep.subr.bf16.mxu1 %v2725_v8  ;;  %v2721_v13 = vld [vmem:[#allocation5 + $0x60] ss:$12 sps:$4 sm:$0xff]  }
  0x37   :  { %672 = vmatpush1.bf16.msra.mxu1 %v2727_v9  ;;  %v2731_v11 = vld [vmem:[#allocation5 + $0x214] ss:$12 sps:$4 sm:$0xff]   ;;  %v2733_v12 = vld [vmem:[#allocation5 + $0x210] ss:$12 sps:$4 sm:$0xff]   ;;  %v2722_v14 = vld [vmem:[#allocation5 + $0x4c] ss:$12 sps:$4 sm:$0xff]  }
  0x38   :  { %673 = vmatprep.subr.bf16.mxu1 %v2731_v11  ;;  %v2737_v15 = vld [vmem:[#allocation5 + $0x1fc] ss:$12 sps:$4 sm:$0xff]   ;;  %v2739_v16 = vld [vmem:[#allocation5 + $0x1f8] ss:$12 sps:$4 sm:$0xff]   ;;  %v2728_v19 = vld [vmem:[#allocation5 + $0x34] ss:$12 sps:$4 sm:$0xff]  }
  0x39   :  { %623 = vmatpush1.bf16.msra.mxu0 %v2715_v5  ;;  %v2724_v17 = vld [vmem:[#allocation5 + $0x48] ss:$12 sps:$4 sm:$0xff]   ;;  %v2743_v18 = vld [vmem:[#allocation5 + $0x1e4] ss:$12 sps:$4 sm:$0xff]   ;;  %v2745_v20 = vld [vmem:[#allocation5 + $0x1e0] ss:$12 sps:$4 sm:$0xff]  }
  0x3a   :  { %624 = vmatprep.subr.bf16.mxu0 %v2716_v6  ;;  %v2730_v21 = vld [vmem:[#allocation5 + $0x30] ss:$12 sps:$4 sm:$0xff]   ;;  %v2749_v22 = vld [vmem:[#allocation5 + $0x1cc] ss:$12 sps:$4 sm:$0xff]   ;;  %v2751_v24 = vld [vmem:[#allocation5 + $0x1c8] ss:$12 sps:$4 sm:$0xff]  }
  0x3b   :  { %674 = vmatpush1.bf16.msra.mxu1 %v2733_v12  ;;  %v2734_v23 = vld [vmem:[#allocation5 + $0x1c] ss:$12 sps:$4 sm:$0xff]   ;;  %v2736_v25 = vld [vmem:[#allocation5 + $0x18] ss:$12 sps:$4 sm:$0xff]   ;;  %v2755_v26 = vld [vmem:[#allocation5 + $0x1b4] ss:$12 sps:$4 sm:$0xff]  }
  0x3c   :  { %675 = vmatprep.subr.bf16.mxu1 %v2737_v15  ;;  %v2740_v27 = vld [vmem:[#allocation5 + $0x4] ss:$12 sps:$4 sm:$0xff]   ;;  %v2742_v29 = vld [vmem:[#allocation5] ss:$12 sps:$4 sm:$0xff]   ;;  %v2761_v30 = vld [vmem:[#allocation5 + $0x19c] ss:$12 sps:$4 sm:$0xff]  }
  0x3d   :  { %625 = vmatpush1.bf16.msra.mxu0 %v2718_v7  ;;  %v2757_v28 = vld [vmem:[#allocation5 + $0x1b0] ss:$12 sps:$4 sm:$0xff]   ;;  %v2746_v31 = vld [vmem:[#allocation5 + $0x16c] ss:$12 sps:$4 sm:$0xff]   ;;  %v2748_v32 = vld [vmem:[#allocation5 + $0x168] ss:$12 sps:$4 sm:$0xff]  }
  0x3e   :  { %626 = vmatprep.subr.bf16.mxu0 %v2719_v10  ;;  %v2763_v33 = vld [vmem:[#allocation5 + $0x198] ss:$12 sps:$4 sm:$0xff]   ;;  %v2752_v35 = vld [vmem:[#allocation5 + $0x154] ss:$12 sps:$4 sm:$0xff]   ;;  %v2754_v37 = vld [vmem:[#allocation5 + $0x150] ss:$12 sps:$4 sm:$0xff]  }
  0x3f   :  { %676 = vmatpush1.bf16.msra.mxu1 %v2739_v16  ;;  %v2767_v34 = vld [vmem:[#allocation5 + $0x184] ss:$12 sps:$4 sm:$0xff]   ;;  %v2769_v36 = vld [vmem:[#allocation5 + $0x180] ss:$12 sps:$4 sm:$0xff]   ;;  %v2758_v39 = vld [vmem:[#allocation5 + $0x13c] ss:$12 sps:$4 sm:$0xff]  }
  0x40   :  { %677 = vmatprep.subr.bf16.mxu1 %v2743_v18  ;;  %v2773_v38 = vld [vmem:[#allocation5 + $0x170] ss:$12 sps:$4 sm:$0xff]   ;;  %v2760_v41 = vld [vmem:[#allocation5 + $0x138] ss:$12 sps:$4 sm:$0xff]   ;;  %v2766_v45 = vld [vmem:[#allocation5 + $0x120] ss:$12 sps:$4 sm:$0xff]  }
  0x41   :  { %627 = vmatpush1.bf16.msra.mxu0 %v2721_v13  ;;  %v3176_v40 = vld [vmem:[#allocation3 + $0x8] ss:$12 sps:$4 sm:$0xff]   ;;  %v2792_v46 = vld [vmem:[#allocation3 + $0x4] ss:$12 sps:$4 sm:$0xff]   ;;  %v2772_v50 = vld [vmem:[#allocation5 + $0x108] ss:$12 sps:$4 sm:$0xff]  }
  0x42   :  { %628 = vmatprep.subr.bf16.mxu0 %v2722_v14  ;;  %v2775_v42 = vld [vmem:[#allocation5 + $0xb0] ss:$12 sps:$4 sm:$0xff]   ;;  %v2779_v43 = vld [vmem:[#allocation5 + $0x158] ss:$12 sps:$4 sm:$0xff]   ;;  %v2784_v48 = vld [vmem:[#allocation5 + $0x140] ss:$12 sps:$4 sm:$0xff]   ;;  %652 = vmatprep.mubr.bf16.mxu0 %v2792_v46 }
  0x43   :  { %678 = vmatpush1.bf16.msra.mxu1 %v2745_v20  ;;  %v2764_v44 = vld [vmem:[#allocation5 + $0x124] ss:$12 sps:$4 sm:$0xff]   ;;  %v2770_v49 = vld [vmem:[#allocation5 + $0x10c] ss:$12 sps:$4 sm:$0xff]   ;;  %v2789_v52 = vld [vmem:[#allocation5 + $0x128] ss:$12 sps:$4 sm:$0xff]  }
  0x44   :  { %679 = vmatprep.subr.bf16.mxu1 %v2749_v22  ;;  %v2780_v47 = vld [vmem:[#allocation5 + $0x98] ss:$12 sps:$4 sm:$0xff]   ;;  %v2785_v51 = vld [vmem:[#allocation5 + $0x80] ss:$12 sps:$4 sm:$0xff]   ;;  %v2778_v54 = vld [vmem:[#allocation5 + $0xf0] ss:$12 sps:$4 sm:$0xff]  }
  0x45   :  { %629 = vmatpush1.bf16.msra.mxu0 %v2724_v17  ;;  %v2776_v53 = vld [vmem:[#allocation5 + $0xf4] ss:$12 sps:$4 sm:$0xff]   ;;  %v3180_v55 = vld [vmem:[#allocation3 + $0x20] ss:$0 sps:$4 sm:$0xff]   ;;  %v2783_v59 = vld [vmem:[#allocation5 + $0xd8] ss:$12 sps:$4 sm:$0xff]  }
  0x46   :  { %630 = vmatprep.subr.bf16.mxu0 %v2728_v19  ;;  %v2793_v56 = vld [vmem:[#allocation5 + $0x68] ss:$12 sps:$4 sm:$0xff]   ;;  %v2795_v57 = vld [vmem:[#allocation5 + $0x110] ss:$12 sps:$4 sm:$0xff]   ;;  %v2798_v61 = vld [vmem:[#allocation5 + $0xf8] ss:$12 sps:$4 sm:$0xff]  }
  0x47   :  { %680 = vmatpush1.bf16.msra.mxu1 %v2751_v24  ;;  %v2781_v58 = vld [vmem:[#allocation5 + $0xdc] ss:$12 sps:$4 sm:$0xff]   ;;  %v2786_v62 = vld [vmem:[#allocation5 + $0xc4] ss:$12 sps:$4 sm:$0xff]   ;;  %v2788_v63 = vld [vmem:[#allocation5 + $0xc0] ss:$12 sps:$4 sm:$0xff]  }
  0x48   :  { %681 = vmatprep.subr.bf16.mxu1 %v2755_v26  ;;  %v2796_v60 = vld [vmem:[#allocation5 + $0x50] ss:$12 sps:$4 sm:$0xff]   ;;  %v2799_v0 = vld [vmem:[#allocation5 + $0x38] ss:$12 sps:$4 sm:$0xff]   ;;  %v2802_v2 = vld [vmem:[#allocation5 + $0xe0] ss:$12 sps:$4 sm:$0xff]  }
  0x49   :  { %631 = vmatpush1.bf16.msra.mxu0 %v2730_v21  ;;  %v2794_v3 = vld [vmem:[#allocation5 + $0x230] ss:$12 sps:$4 sm:$0xff]   ;;  %v94_v4 = vld [vmem:[#allocation3 + $0x18] sm:$0xff]  ;;  %v2804_v6 = vld [vmem:[#allocation5 + $0x20] ss:$12 sps:$4 sm:$0xff]  }
  0x4a   :  { %632 = vmatprep.subr.bf16.mxu0 %v2734_v23  ;;  %v2790_v5 = vld [vmem:[#allocation3] ss:$12 sps:$4 sm:$0xff]   ;;  %v2310_v7 = vcombine.high %v94_v4, %v94_v4  ;;  %v2797_v8 = vld [vmem:[#allocation5 + $0x218] ss:$12 sps:$4 sm:$0xff]   ;;  %v2800_v12 = vld [vmem:[#allocation5 + $0x200] ss:$12 sps:$4 sm:$0xff]   ;;  %v2309_v13 = vcombine.low %v94_v4, %v94_v4 }
  0x4b   :  { %682 = vmatpush1.bf16.msra.mxu1 %v2757_v28  ;;  %v2807_v9 = vld [vmem:[#allocation5 + $0xc8] ss:$12 sps:$4 sm:$0xff]   ;;  %v2815_v11 = vld [vmem:[#allocation7 + $0xac] ss:$12 sps:$4 sm:$0xff]   ;;  %v2809_v17 = vld [vmem:[#allocation5 + $0x1d0] ss:$12 sps:$4 sm:$0xff]  }
  0x4c   :  { %683 = vmatprep.subr.bf16.mxu1 %v2761_v30  ;;  %v2808_v10 = vld [vmem:[#allocation5 + $0x8] ss:$12 sps:$4 sm:$0xff]   ;;  %v2816_v18 = vld [vmem:[#allocation7 + $0x90] ss:$12 sps:$4 sm:$0xff]   ;;  %v2810_v20 = vld [vmem:[#allocation5 + $0x1b8] ss:$12 sps:$4 sm:$0xff]  }
  0x4d   :  { %633 = vmatpush1.bf16.msra.mxu0 %v2736_v25  ;;  %v2806_v14 = vld [vmem:[#allocation5 + $0x1e8] ss:$12 sps:$4 sm:$0xff]   ;;  %v2819_v21 = vld [vmem:[#allocation7 + $0x78] ss:$12 sps:$4 sm:$0xff]   ;;  %v2811_v23 = vld [vmem:[#allocation5 + $0x1a0] ss:$12 sps:$4 sm:$0xff]  }
  0x4e   :  { %634 = vmatprep.subr.bf16.mxu0 %v2740_v27  ;;  %v2813_v15 = vld [vmem:[#allocation7 + $0xa8] ss:$12 sps:$4 sm:$0xff]   ;;  %v2824_v22 = vld [vmem:[#allocation7 + $0x64] ss:$12 sps:$4 sm:$0xff]   ;;  %v2822_v24 = vld [vmem:[#allocation7 + $0x60] ss:$12 sps:$4 sm:$0xff]  }
  0x4f   :  { %684 = vmatpush1.bf16.msra.mxu1 %v2763_v33  ;;  %v2818_v16 = vld [vmem:[#allocation7 + $0x94] ss:$12 sps:$4 sm:$0xff]   ;;  %v2821_v19 = vld [vmem:[#allocation7 + $0x7c] ss:$12 sps:$4 sm:$0xff]   ;;  %v2827_v25 = vld [vmem:[#allocation7 + $0x4c] ss:$12 sps:$4 sm:$0xff]  }
  0x50   :  { %685 = vmatprep.subr.bf16.mxu1 %v2767_v34  ;;  %v2812_v26 = vld [vmem:[#allocation5 + $0x188] ss:$12 sps:$4 sm:$0xff]   ;;  %v2834_v33 = vld [vmem:[#allocation7] ss:$12 sps:$4 sm:$0xff]   ;;  %v2893_v4 = vld [vmem:[#allocation7 + $0x170] ss:$12 sps:$4 sm:$0xff]  }
  0x51   :  { %635 = vmatpush1.bf16.msra.mxu0 %v2742_v29  ;;  %v2825_v27 = vld [vmem:[#allocation7 + $0x48] ss:$12 sps:$4 sm:$0xff]   ;;  %v2828_v29 = vld [vmem:[#allocation7 + $0x30] ss:$12 sps:$4 sm:$0xff]   ;;  %v2839_v34 = vld [vmem:[#allocation7 + $0x16c] ss:$12 sps:$4 sm:$0xff]  }
  0x52   :  { %636 = vmatprep.subr.bf16.mxu0 %v2746_v31  ;;  %v2830_v28 = vld [vmem:[#allocation7 + $0x34] ss:$12 sps:$4 sm:$0xff]   ;;  %v2833_v30 = vld [vmem:[#allocation7 + $0x1c] ss:$12 sps:$4 sm:$0xff]   ;;  %v2831_v31 = vld [vmem:[#allocation7 + $0x18] ss:$12 sps:$4 sm:$0xff]  }
  0x53   :  { %686 = vmatpush1.bf16.msra.mxu1 %v2769_v36  ;;  %v2842_v36 = vld [vmem:[#allocation7 + $0x154] ss:$12 sps:$4 sm:$0xff]  }
  0x54   :  { %2529 = vmatprep.subr.bf16.mxu1 %v2773_v38  ;;  %v2845_v38 = vld [vmem:[#allocation7 + $0x13c] ss:$12 sps:$4 sm:$0xff]  }
  0x55   :  { %637 = vmatpush2.bf16.msra.mxu0 %v2748_v32  ;;  %v2836_v32 = vld [vmem:[#allocation7 + $0x4] ss:$12 sps:$4 sm:$0xff]  }
  0x56   :  { %638 = vmatprep.subr.bf16.mxu0 %v2752_v35  ;;  %704 = vmatmul.mubr.bf16.vlgmr.msra.gmra.mxu1 %v3176_v40  ;;  %v2837_v35 = vld [vmem:[#allocation7 + $0x168] ss:$12 sps:$4 sm:$0xff]  }
  0x57   :  { %2530 = vmatpush3.bf16.msra.mxu1 %v2775_v42  ;;  %713 = vmatprep.mubr.bf16.mxu1 %v3097_v1  ;;  %v2851_v42 = vld [vmem:[#allocation7 + $0x10c] ss:$12 sps:$4 sm:$0xff]  }
  0x58   :  { %2531 = vmatprep.subr.bf16.mxu1 %v2779_v43  ;;  %v2849_v43 = vld [vmem:[#allocation7 + $0x108] ss:$12 sps:$4 sm:$0xff]  }
  0x59   :  { %639 = vmatpush2.bf16.msra.mxu0 %v2754_v37  ;;  %v2840_v37 = vld [vmem:[#allocation7 + $0x150] ss:$12 sps:$4 sm:$0xff]  }
  0x5a   :  { %640 = vmatprep.subr.bf16.mxu0 %v2758_v39  ;;  %v2843_v39 = vld [vmem:[#allocation7 + $0x138] ss:$12 sps:$4 sm:$0xff]  }
  0x5b   :  { %2532 = vmatpush3.bf16.msra.mxu1 %v2780_v47  ;;  %v2855_v47 = vld [vmem:[#allocation7 + $0xd8] ss:$12 sps:$4 sm:$0xff]  }
  0x5c   :  { %2533 = vmatprep.subr.bf16.mxu1 %v2784_v48  ;;  %v2860_v48 = vld [vmem:[#allocation7 + $0xc4] ss:$12 sps:$4 sm:$0xff]  }
  0x5d   :  { %641 = vmatpush2.bf16.msra.mxu0 %v2760_v41  ;;  %v2846_v41 = vld [vmem:[#allocation7 + $0x120] ss:$12 sps:$4 sm:$0xff]  }
  0x5e   :  { %642 = vmatprep.subr.bf16.mxu0 %v2764_v44  ;;  %714 = vmatmul.mubr.bf16.gmra.mxu1 %v3180_v55  ;;  %v2854_v44 = vld [vmem:[#allocation7 + $0xf4] ss:$12 sps:$4 sm:$0xff]  }
  0x5f   :  { %2534 = vmatpush3.bf16.msra.mxu1 %v2785_v51  ;;  %754 = vmatprep.mubr.bf16.mxu1 %v2792_v46  ;;  %v2857_v46 = vld [vmem:[#allocation7 + $0xdc] ss:$12 sps:$4 sm:$0xff]  }
  0x60   :  { %2535 = vmatprep.subr.bf16.mxu1 %v2789_v52  ;;  %v2861_v51 = vld [vmem:[#allocation7 + $0x228] ss:$12 sps:$4 sm:$0xff]   ;;  %v3186_v52 = vld [vmem:[#allocation7 + $0x230] ss:$12 sps:$4 sm:$0xff]  }
  0x61   :  { %643 = vmatpush2.bf16.msra.mxu0 %v2766_v45  ;;  %v2852_v45 = vld [vmem:[#allocation7 + $0xf0] ss:$12 sps:$4 sm:$0xff]  }
  0x62   :  { %644 = vmatprep.subr.bf16.mxu0 %v2770_v49  ;;  %v2858_v49 = vld [vmem:[#allocation7 + $0xc0] ss:$12 sps:$4 sm:$0xff]  }
  0x63   :  { %2536 = vmatpush3.bf16.msra.mxu1 %v2793_v56  ;;  %v2871_v56 = vld [vmem:[#allocation7 + $0x1fc] ss:$12 sps:$4 sm:$0xff]  }
  0x64   :  { %2537 = vmatprep.subr.bf16.mxu1 %v2795_v57  ;;  %v2875_v57 = vld [vmem:[#allocation7 + $0x1e4] ss:$12 sps:$4 sm:$0xff]  }
  0x65   :  { %645 = vmatpush2.bf16.msra.mxu0 %v2772_v50  ;;  %v2863_v50 = vld [vmem:[#allocation7 + $0x22c] ss:$12 sps:$4 sm:$0xff]  }
  0x66   :  { %646 = vmatprep.subr.bf16.mxu0 %v2776_v53  ;;  %v2867_v53 = vld [vmem:[#allocation7 + $0x214] ss:$12 sps:$4 sm:$0xff]  }
  0x67   :  { %2538 = vmatpush3.bf16.msra.mxu1 %v2796_v60  ;;  %v2879_v60 = vld [vmem:[#allocation7 + $0x1cc] ss:$12 sps:$4 sm:$0xff]  }
  0x68   :  { %2539 = vmatprep.subr.bf16.mxu1 %v2798_v61  ;;  %v2883_v61 = vld [vmem:[#allocation7 + $0x1b4] ss:$12 sps:$4 sm:$0xff]  }
  0x69   :  { %647 = vmatpush2.bf16.msra.mxu0 %v2778_v54  ;;  %v2865_v54 = vld [vmem:[#allocation7 + $0x210] ss:$12 sps:$4 sm:$0xff]  }
  0x6a   :  { %648 = vmatprep.subr.bf16.mxu0 %v2781_v58  ;;  %v2873_v58 = vld [vmem:[#allocation7 + $0x1e0] ss:$12 sps:$4 sm:$0xff]  }
  0x6b   :  { %2540 = vmatpush3.bf16.msra.mxu1 %v2799_v0  ;;  %v2885_v0 = vld [vmem:[#allocation7 + $0x198] ss:$12 sps:$4 sm:$0xff]  }
  0x6c   :  { %2541 = vmatprep.subr.bf16.mxu1 %v2802_v2  ;;  %v2891_v2 = vld [vmem:[#allocation7 + $0x184] ss:$12 sps:$4 sm:$0xff]  }
  0x6d   :  { %649 = vmatpush2.bf16.msra.mxu0 %v2783_v59  ;;  %v2877_v59 = vld [vmem:[#allocation7 + $0x1c8] ss:$12 sps:$4 sm:$0xff]  }
  0x6e   :  { %650 = vmatprep.subr.bf16.mxu0 %v2786_v62  ;;  %v2881_v62 = vld [vmem:[#allocation7 + $0x1b0] ss:$12 sps:$4 sm:$0xff]  }
  0x6f   :  { %2542 = vmatpush3.bf16.msra.mxu1 %v2804_v6 }
  0x70   :  { %2543 = vmatprep.subr.bf16.mxu1 %v2807_v9 }
  0x71   :  { %651 = vmatpush2.bf16.msra.mxu0 %v2788_v63  ;;  %v2887_v63 = vld [vmem:[#allocation7 + $0x19c] ss:$12 sps:$4 sm:$0xff]  }
  0x72   :  { %2643 = vmatprep.subr.bf16.mxu0 %v2794_v3 }
  0x73   :  { %2544 = vmatpush3.bf16.msra.mxu1 %v2808_v10  ;;  %v194_v10 = vlaneseq }
  0x74   :  { %653 = vmatmul.mubr.bf16.vlgmr.msra.gmra.mxu0 %v2790_v5  ;;  %1330 = vmatprep.subr.bf16.mxu1 %v2815_v11 }
  0x75   :  { %2644 = vmatpush3.bf16.msra.mxu0 %v2794_v3  ;;  %662 = vmatprep.mubr.bf16.mxu0 %v2310_v7  ;;  %v2889_v3 = vld [vmem:[#allocation7 + $0x180] ss:$12 sps:$4 sm:$0xff]  }
  0x76   :  { %2645 = vmatprep.subr.bf16.mxu0 %v2797_v8  ;;  %755 = vmatmul.mubr.bf16.vlgmr.msra.gmra.mxu1 %v2790_v5 }
  0x77   :  { %762 = vmatprep.mubr.bf16.mxu1 %v2310_v7  ;;  %1331 = vmatpush1.bf16.msra.mxu1 %v2813_v15 }
  0x78   :  { %1332 = vmatprep.subr.bf16.mxu1 %v2818_v16 }
  0x79   :  { %2646 = vmatpush3.bf16.msra.mxu0 %v2797_v8 }
  0x7a   :  { %2647 = vmatprep.subr.bf16.mxu0 %v2800_v12 }
  0x7b   :  { %1333 = vmatpush1.bf16.msra.mxu1 %v2816_v18 }
  0x7c   :  { %663 = vmatmul.mubr.bf16.gmra.mxu0 %v2309_v13  ;;  %1334 = vmatprep.subr.bf16.mxu1 %v2821_v19 }
  0x7d   :  { %2648 = vmatpush3.bf16.msra.mxu0 %v2800_v12  ;;  %2659 = vmatprep.mubr.bf16.mxu0 %v3176_v40  ;;  %v2848_v40 = vld [vmem:[#allocation7 + $0x124] ss:$12 sps:$4 sm:$0xff]  }
  0x7e   :  { %2649 = vmatprep.subr.bf16.mxu0 %v2806_v14  ;;  %763 = vmatmul.mubr.bf16.gmra.mxu1 %v2309_v13  ;;  %v195_v13 = vshrl.u32 %v194_v10, 7 }
  0x7f   :  { %1335 = vmatpush1.bf16.msra.mxu1 %v2819_v21 }
  0x80   :  { %1336 = vmatprep.subr.bf16.mxu1 %v2824_v22  ;;  %v3189_v15 = vsub.s32 1, %v195_v13  ;;  %v3191_v16 = vsub.s32 0, %v195_v13 }
  0x81   :  { %2650 = vmatpush3.bf16.msra.mxu0 %v2806_v14 }
  0x82   :  { %2651 = vmatprep.subr.bf16.mxu0 %v2809_v17 }
  0x83   :  { %1337 = vmatpush1.bf16.msra.mxu1 %v2822_v24 }
  0x84   :  { %1338 = vmatprep.subr.bf16.mxu1 %v2827_v25 }
  0x85   :  { %2652 = vmatpush3.bf16.msra.mxu0 %v2809_v17  ;;  %v192_v17 = vld [vmem:[%s3273_s2] sm:$0x7] }
  0x86   :  { %2653 = vmatprep.subr.bf16.mxu0 %v2810_v20  ;;  %v201_v18 = vrot.slane %v192_v17, %v3189_v15  ;;  %v197_v19 = vrot.slane %v192_v17, %v3191_v16 }
  0x87   :  { %1339 = vmatpush1.bf16.msra.mxu1 %v2825_v27 }
  0x88   :  { %1340 = vmatprep.subr.bf16.mxu1 %v2830_v28 }
  0x89   :  { %2654 = vmatpush3.bf16.msra.mxu0 %v2810_v20 }
  0x8a   :  { %2655 = vmatprep.subr.bf16.mxu0 %v2811_v23 }
  0x8b   :  { %1341 = vmatpush1.bf16.msra.mxu1 %v2828_v29 }
  0x8c   :  { %1342 = vmatprep.subr.bf16.mxu1 %v2833_v30 }
  0x8d   :  { %2656 = vmatpush3.bf16.msra.mxu0 %v2811_v23 }
  0x8e   :  { %2657 = vmatprep.subr.bf16.mxu0 %v2812_v26 }
  0x8f   :  { %1343 = vmatpush1.bf16.msra.mxu1 %v2831_v31 }
  0x90   :  { %1344 = vmatprep.subr.bf16.mxu1 %v2836_v32 }
  0x91   :  { %2658 = vmatpush3.bf16.msra.mxu0 %v2812_v26 }
  0x92   :  { %1381 = vmatprep.subr.bf16.mxu0 %v2863_v50 }
  0x93   :  { %1345 = vmatpush1.bf16.msra.mxu1 %v2834_v33 }
  0x94   :  { %2660 = vmatmul.mubr.bf16.vlgmr.msra.gmra.mxu0 %v3180_v55  ;;  %1346 = vmatprep.subr.bf16.mxu1 %v2839_v34  ;;  %v2869_v55 = vld [vmem:[#allocation7 + $0x1f8] ss:$12 sps:$4 sm:$0xff]  }
  0x95   :  { %1413 = vmatprep.mubr.bf16.mxu0 %v3097_v1  ;;  %1382 = vmatpush1.bf16.msra.mxu0 %v2861_v51 }
  0x96   :  { %1383 = vmatprep.subr.bf16.mxu0 %v2867_v53 }
  0x97   :  { %1347 = vmatpush2.bf16.msra.mxu1 %v2837_v35 }
  0x98   :  { %1348 = vmatprep.subr.bf16.mxu1 %v2842_v36 }
  0x99   :  { %1384 = vmatpush1.bf16.msra.mxu0 %v2865_v54 }
  0x9a   :  { %1385 = vmatprep.subr.bf16.mxu0 %v2871_v56 }
  0x9b   :  { %1349 = vmatpush2.bf16.msra.mxu1 %v2840_v37 }
  0x9c   :  { %1350 = vmatprep.subr.bf16.mxu1 %v2845_v38 }
  0x9d   :  { %1386 = vmatpush1.bf16.msra.mxu0 %v2869_v55 }
  0x9e   :  { %1387 = vmatprep.subr.bf16.mxu0 %v2875_v57  ;;  %v2872_v57 = vld [vmem:[#allocation7 + $0x200] ss:$12 sps:$4 sm:$0xff]  }
  0x9f   :  { %1351 = vmatpush2.bf16.msra.mxu1 %v2843_v39 }
  0xa0   :  { %1352 = vmatprep.subr.bf16.mxu1 %v2848_v40 }
  0xa1   :  { %1388 = vmatpush1.bf16.msra.mxu0 %v2873_v58 }
  0xa2   :  { %1389 = vmatprep.subr.bf16.mxu0 %v2879_v60 }
  0xa3   :  { %1353 = vmatpush2.bf16.msra.mxu1 %v2846_v41 }
  0xa4   :  { %1354 = vmatprep.subr.bf16.mxu1 %v2851_v42 }
  0xa5   :  { %1390 = vmatpush1.bf16.msra.mxu0 %v2877_v59 }
  0xa6   :  { %1391 = vmatprep.subr.bf16.mxu0 %v2883_v61  ;;  %v2876_v61 = vld [vmem:[#allocation7 + $0x1e8] ss:$12 sps:$4 sm:$0xff]  }
  0xa7   :  { %1355 = vmatpush2.bf16.msra.mxu1 %v2849_v43 }
  0xa8   :  { %1356 = vmatprep.subr.bf16.mxu1 %v2854_v44 }
  0xa9   :  { %1392 = vmatpush1.bf16.msra.mxu0 %v2881_v62  ;;  %v2880_v62 = vld [vmem:[#allocation7 + $0x1d0] ss:$12 sps:$4 sm:$0xff]  }
  0xaa   :  { %1393 = vmatprep.subr.bf16.mxu0 %v2887_v63  ;;  %v3211_v63 = vsub.s32 2, %v195_v13 }
  0xab   :  { %1357 = vmatpush2.bf16.msra.mxu1 %v2852_v45 }
  0xac   :  { %1358 = vmatprep.subr.bf16.mxu1 %v2857_v46 }
  0xad   :  { %1394 = vmatpush1.bf16.msra.mxu0 %v2885_v0  ;;  %v205_v0 = vrot.slane %v192_v17, %v3211_v63 }
  0xae   :  { %1395 = vmatprep.subr.bf16.mxu0 %v2891_v2  ;;  %v2884_v2 = vld [vmem:[#allocation7 + $0x1b8] ss:$12 sps:$4 sm:$0xff]  }
  0xaf   :  { %1359 = vmatpush2.bf16.msra.mxu1 %v2855_v47 }
  0xb0   :  { %1360 = vmatprep.subr.bf16.mxu1 %v2860_v48 }
  0xb1   :  { %1396 = vmatpush1.bf16.msra.mxu0 %v2889_v3 }
  0xb2   :  { %2567 = vmatprep.subr.bf16.mxu0 %v2893_v4 }
  0xb3   :  { %1361 = vmatpush2.bf16.msra.mxu1 %v2858_v49  ;;  %v2868_v49 = vld [vmem:[#allocation7 + $0x218] ss:$12 sps:$4 sm:$0xff]  }
  0xb4   :  { %2663 = vmatprep.subr.bf16.mxu1 %v3186_v52 }
 0x116   :  { %v705_v5 = vpop.f32.mrf.mxu1 }
 0x118   :  { %v707_v6 = vpop.f32.mrf.mxu1 }
 0x11a   :  { %v709_v7 = vpop.f32.mrf.mxu1 }
 0x11c   :  { %v711_v8 = vpop.f32.mrf.mxu1 }
 0x11e   :  { %v715_v9 = vpop.f32.mrf.mxu1 }
 0x120   :  { %v717_v11 = vpop.f32.mrf.mxu1 }
 0x122   :  { %v719_v12 = vpop.f32.mrf.mxu1 }
 0x124   :  { %v720_v14 = vpop.f32.mrf.mxu1 }
 0x134   :  { %v654_v20 = vpop.f32.mrf.mxu0 }
 0x135   :  { %v655_v23 = vadd.f32 %v654_v20, %v197_v19 }
 0x136   :  { %v656_v21 = vpop.f32.mrf.mxu0  ;;  %v2545_v30 = vpop.f32.mrf.mxu1 }
 0x137   :  { %v657_v22 = vadd.f32 %v656_v21, %v201_v18  ;;  %v706_v31 = vadd.f32 %v705_v5, %v655_v23 }
 0x138   :  { %v658_v24 = vpop.f32.mrf.mxu0  ;;  %v2546_v35 = vpop.f32.mrf.mxu1 }
 0x139   :  { %v659_v25 = vadd.f32 %v658_v24, %v197_v19  ;;  %v708_v27 = vadd.f32 %v707_v6, %v657_v22  ;;  %v818_v42 = vmax.f32 %v706_v31, 0.0  ;;  %v2547_v3 = vadd.f32 %v2546_v35, %v2545_v30  ;;  %v2894_v22 = vld [vmem:[#allocation7 + $0xb0] ss:$12 sps:$4 sm:$0xff]   ;;  %v2895_v24 = vld [vmem:[#allocation7 + $0x158] ss:$12 sps:$4 sm:$0xff]  }
 0x13a   :  { %v660_v26 = vpop.f32.mrf.mxu0  ;;  %v2548_v41 = vpop.f32.mrf.mxu1  ;;  %v2900_v30 = vld [vmem:[#allocation7 + $0x68] ss:$12 sps:$4 sm:$0xff]   ;;  %v2901_v31 = vld [vmem:[#allocation7 + $0x110] ss:$12 sps:$4 sm:$0xff]   ;;  %v2905_v35 = vld [vmem:[#allocation7 + $0xe0] ss:$12 sps:$4 sm:$0xff]  }
 0x13b   :  { %v710_v28 = vadd.f32 %v709_v7, %v659_v25  ;;  %v661_v29 = vadd.f32 %v660_v26, %v201_v18  ;;  %v819_v38 = vmax.f32 %v708_v27, 0.0  ;;  %v2896_v26 = vld [vmem:[#allocation7 + $0x98] ss:$12 sps:$4 sm:$0xff]   ;;  %v2897_v27 = vld [vmem:[#allocation7 + $0x140] ss:$12 sps:$4 sm:$0xff]  }
 0x13c   :  { %v664_v32 = vpop.f32.mrf.mxu0  ;;  %v2549_v47 = vpop.f32.mrf.mxu1 }
 0x13d   :  { %v712_v33 = vadd.f32 %v711_v8, %v661_v29  ;;  %v665_v34 = vadd.f32 %v664_v32, %v197_v19  ;;  %v821_v36 = vmax.f32 %v710_v28, 0.0  ;;  %v2550_v5 = vadd.f32 %v2549_v47, %v2548_v41  ;;  %v2888_v8 = vld [vmem:[#allocation7 + $0x1a0] ss:$12 sps:$4 sm:$0xff]   ;;  %v2899_v29 = vld [vmem:[#allocation7 + $0x128] ss:$12 sps:$4 sm:$0xff]  }
 0x13e   :  { %v666_v37 = vpop.f32.mrf.mxu0  ;;  %v2551_v53 = vpop.f32.mrf.mxu1  ;;  %v2898_v28 = vld [vmem:[#allocation7 + $0x80] ss:$12 sps:$4 sm:$0xff]   ;;  %v2902_v32 = vld [vmem:[#allocation7 + $0x50] ss:$12 sps:$4 sm:$0xff]  }
 0x13f   :  { %v822_v39 = vmax.f32 %v712_v33, 0.0  ;;  %v667_v40 = vadd.f32 %v666_v37, %v201_v18  ;;  %v716_v43 = vadd.f32 %v715_v9, %v665_v34  ;;  %v3200_v48 = vpack.c.bf16 %v821_v36, %v818_v42  ;;  %v2892_v18 = vld [vmem:[#allocation7 + $0x188] ss:$12 sps:$4 sm:$0xff]   ;;  %v2903_v33 = vld [vmem:[#allocation7 + $0xf8] ss:$12 sps:$4 sm:$0xff]  }
 0x140   :  { %v668_v44 = vpop.f32.mrf.mxu0  ;;  %v2552_v56 = vpop.f32.mrf.mxu1  ;;  %v757_v9 = vadd.f32 %v2547_v3, %v205_v0  ;;  %v760_v12 = vadd.f32 %v2550_v5, %v205_v0  ;;  %v2904_v34 = vld [vmem:[#allocation7 + $0x38] ss:$12 sps:$4 sm:$0xff]   ;;  %v2906_v36 = vld [vmem:[#allocation7 + $0x20] ss:$12 sps:$4 sm:$0xff]   ;;  %v2907_v37 = vld [vmem:[#allocation7 + $0xc8] ss:$12 sps:$4 sm:$0xff]  }
 0x141   :  { %v718_v45 = vadd.f32 %v717_v11, %v667_v40  ;;  %v3198_v46 = vpack.c.bf16 %v822_v39, %v819_v38  ;;  %v824_v54 = vmax.f32 %v716_v43, 0.0  ;;  %v2908_v38 = vld [vmem:[#allocation7 + $0x8] ss:$12 sps:$4 sm:$0xff]   ;;  %v2911_v39 = vld [vmem:[#allocation8 + $0xac] ss:$12 sps:$4 sm:$0xff]  }
 0x142   :  { %v669_v50 = vpop.f32.mrf.mxu0  ;;  %v2554_v58 = vpop.f32.mrf.mxu1  ;;  %v2909_v40 = vld [vmem:[#allocation8 + $0xa8] ss:$12 sps:$4 sm:$0xff]   ;;  %v2912_v42 = vld [vmem:[#allocation8 + $0x90] ss:$12 sps:$4 sm:$0xff]   ;;  %v2915_v44 = vld [vmem:[#allocation8 + $0x78] ss:$12 sps:$4 sm:$0xff]  }
 0x143   :  { %v825_v51 = vmax.f32 %v718_v45, 0.0  ;;  %1362 = vmatprep.mubr.bf16.mxu1 %v3198_v46  ;;  %v3208_v59 = vpack.c.bf16 %v824_v54, %v824_v54  ;;  %v2914_v41 = vld [vmem:[#allocation8 + $0x94] ss:$12 sps:$4 sm:$0xff]   ;;  %v2917_v43 = vld [vmem:[#allocation8 + $0x7c] ss:$12 sps:$4 sm:$0xff]  }
 0x144   :  { %1363 = vmatmul.mubr.bf16.vlgmr.msra.gmra.mxu1 %v3200_v48  ;;  %v2555_v60 = vpop.f32.mrf.mxu1  ;;  %v2920_v45 = vld [vmem:[#allocation8 + $0x64] ss:$12 sps:$4 sm:$0xff]   ;;  %v2923_v47 = vld [vmem:[#allocation8 + $0x4c] ss:$12 sps:$4 sm:$0xff]   ;;  %v2938_v58 = vld [vmem:[#allocation8 + $0x154] ss:$12 sps:$4 sm:$0xff]  }
 0x145   :  { %v3204_v55 = vpack.c.bf16 %v825_v51, %v825_v51  ;;  %2664 = vmatpush3.bf16.msra.mxu1 %v3186_v52  ;;  %v2553_v52 = vadd.f32 %v2552_v56, %v2551_v53  ;;  %v2924_v50 = vld [vmem:[#allocation8 + $0x30] ss:$12 sps:$4 sm:$0xff]   ;;  %v2927_v53 = vld [vmem:[#allocation8 + $0x18] ss:$12 sps:$4 sm:$0xff]   ;;  %v2950_v3 = vld [vmem:[#allocation8 + $0xf4] ss:$12 sps:$4 sm:$0xff]  }
 0x146   :  { %2665 = vmatprep.subr.bf16.mxu1 %v2868_v49  ;;  %v2929_v51 = vld [vmem:[#allocation8 + $0x1c] ss:$12 sps:$4 sm:$0xff]   ;;  %v2932_v54 = vld [vmem:[#allocation8 + $0x4] ss:$12 sps:$4 sm:$0xff]   ;;  %v2935_v56 = vld [vmem:[#allocation8 + $0x16c] ss:$12 sps:$4 sm:$0xff]  }
 0x147   :  { %1372 = vmatprep.mubr.bf16.mxu1 %v3204_v55  ;;  %v765_v6 = vadd.f32 %v2553_v52, %v205_v0  ;;  %v2941_v60 = vld [vmem:[#allocation8 + $0x13c] ss:$12 sps:$4 sm:$0xff]   ;;  %v2942_v52 = vld [vmem:[#allocation8 + $0x120] ss:$12 sps:$4 sm:$0xff]  }
 0x148   :  { %v2947_v0 = vld [vmem:[#allocation8 + $0x10c] ss:$12 sps:$4 sm:$0xff]   ;;  %v2957_v5 = vld [vmem:[#allocation8 + $0x228] ss:$12 sps:$4 sm:$0xff]  }
 0x149   :  { %2666 = vmatpush3.bf16.msra.mxu1 %v2868_v49  ;;  %v2921_v49 = vld [vmem:[#allocation8 + $0x48] ss:$12 sps:$4 sm:$0xff]  }
 0x14a   :  { %2667 = vmatprep.subr.bf16.mxu1 %v2872_v57 }
 0x14c   :  { %1373 = vmatmul.mubr.bf16.gmra.mxu1 %v3208_v59 }
 0x14d   :  { %2668 = vmatpush3.bf16.msra.mxu1 %v2872_v57  ;;  %v2933_v57 = vld [vmem:[#allocation8 + $0x168] ss:$12 sps:$4 sm:$0xff]  }
 0x14e   :  { %2669 = vmatprep.subr.bf16.mxu1 %v2876_v61 }
 0x151   :  { %2670 = vmatpush3.bf16.msra.mxu1 %v2876_v61  ;;  %v2939_v61 = vld [vmem:[#allocation8 + $0x138] ss:$12 sps:$4 sm:$0xff]  }
 0x152   :  { %2671 = vmatprep.subr.bf16.mxu1 %v2880_v62 }
 0x154   :  { %v2661_v4 = vpop.f32.mrf.mxu0 }
 0x155   :  { %2672 = vmatpush3.bf16.msra.mxu1 %v2880_v62  ;;  %v813_v13 = vadd.f32 %v2661_v4, %v765_v6  ;;  %v2944_v62 = vld [vmem:[#allocation8 + $0x124] ss:$12 sps:$4 sm:$0xff]   ;;  %v2959_v4 = vld [vmem:[#allocation8 + $0x22c] ss:$12 sps:$4 sm:$0xff]  }
 0x156   :  { %v804_v7 = vpop.f32.mrf.mxu0  ;;  %2673 = vmatprep.subr.bf16.mxu1 %v2884_v2  ;;  %v2948_v6 = vld [vmem:[#allocation8 + $0xf0] ss:$12 sps:$4 sm:$0xff]  }
 0x157   :  { %v805_v11 = vadd.f32 %v804_v7, %v757_v9  ;;  %v826_v21 = vmax.f32 %v813_v13, 0.0  ;;  %v2960_v7 = vld [vmem:[#allocation8 + $0x210] ss:$12 sps:$4 sm:$0xff]  }
 0x158   :  { %v2662_v10 = vpop.f32.mrf.mxu0  ;;  %v2953_v9 = vld [vmem:[#allocation8 + $0xdc] ss:$12 sps:$4 sm:$0xff]  }
 0x159   :  { %2674 = vmatpush3.bf16.msra.mxu1 %v2884_v2  ;;  %v820_v17 = vmax.f32 %v805_v11, 0.0  ;;  %v832_v25 = vpack.c.bf16 %v826_v21, %v826_v21  ;;  %v2945_v2 = vld [vmem:[#allocation8 + $0x108] ss:$12 sps:$4 sm:$0xff]   ;;  %v2951_v10 = vld [vmem:[#allocation8 + $0xd8] ss:$12 sps:$4 sm:$0xff]  }
 0x15a   :  { %v807_v14 = vpop.f32.mrf.mxu0  ;;  %2675 = vmatprep.subr.bf16.mxu1 %v2888_v8  ;;  %v2956_v11 = vld [vmem:[#allocation8 + $0xc4] ss:$12 sps:$4 sm:$0xff]   ;;  %v2966_v13 = vld [vmem:[#allocation8 + $0x1fc] ss:$12 sps:$4 sm:$0xff]  }
 0x15b   :  { %v808_v19 = vadd.f32 %v807_v14, %v760_v12  ;;  %v2964_v12 = vld [vmem:[#allocation8 + $0x1f8] ss:$12 sps:$4 sm:$0xff]   ;;  %v2972_v21 = vld [vmem:[#allocation8 + $0x1c8] ss:$12 sps:$4 sm:$0xff]  }
 0x15c   :  { %v2970_v14 = vld [vmem:[#allocation8 + $0x1e4] ss:$12 sps:$4 sm:$0xff]  }
 0x15d   :  { %v823_v20 = vmax.f32 %v808_v19, 0.0  ;;  %2676 = vmatpush3.bf16.msra.mxu1 %v2888_v8  ;;  %v2962_v8 = vld [vmem:[#allocation8 + $0x214] ss:$12 sps:$4 sm:$0xff]  }
 0x15e   :  { %2677 = vmatprep.subr.bf16.mxu1 %v2892_v18  ;;  %v2968_v19 = vld [vmem:[#allocation8 + $0x1e0] ss:$12 sps:$4 sm:$0xff]  }
 0x15f   :  { %v829_v23 = vpack.c.bf16 %v823_v20, %v820_v17  ;;  %v3220_v17 = vld [vmem:[#allocation8 + $0x230] ss:$12 sps:$4 sm:$0xff]   ;;  %v2974_v20 = vld [vmem:[#allocation8 + $0x1cc] ss:$12 sps:$4 sm:$0xff]  }
 0x161   :  { %2678 = vmatpush3.bf16.msra.mxu1 %v2892_v18  ;;  %1414 = vmatmul.mubr.bf16.vlgmr.msra.gmra.mxu0 %v829_v23  ;;  %v2954_v18 = vld [vmem:[#allocation8 + $0xc0] ss:$12 sps:$4 sm:$0xff]  }
 0x162   :  { %2568 = vmatpush3.bf16.msra.mxu0 %v2894_v22  ;;  %2679 = vmatprep.mubr.bf16.mxu1 %v829_v23  ;;  %v2978_v22 = vld [vmem:[#allocation8 + $0x1b4] ss:$12 sps:$4 sm:$0xff]   ;;  %v2976_v23 = vld [vmem:[#allocation8 + $0x1b0] ss:$12 sps:$4 sm:$0xff]  }
 0x163   :  { %2569 = vmatprep.subr.bf16.mxu0 %v2895_v24  ;;  %1423 = vmatprep.mubr.bf16.mxu0 %v3097_v1  ;;  %v2982_v24 = vld [vmem:[#allocation8 + $0x19c] ss:$12 sps:$4 sm:$0xff]  }
 0x164   :  { %2680 = vmatmul.mubr.bf16.vlgmr.msra.gmra.mxu1 %v832_v25  ;;  %2091 = vmatprep.subr.bf16.mxu1 %v2959_v4 }
 0x165   :  { %2123 = vmatprep.mubr.bf16.mxu1 %v3097_v1  ;;  %2092 = vmatpush1.bf16.msra.mxu1 %v2957_v5 }
 0x166   :  { %2570 = vmatpush3.bf16.msra.mxu0 %v2896_v26  ;;  %2093 = vmatprep.subr.bf16.mxu1 %v2962_v8  ;;  %v2986_v26 = vld [vmem:[#allocation8 + $0x184] ss:$12 sps:$4 sm:$0xff]  }
 0x167   :  { %2571 = vmatprep.subr.bf16.mxu0 %v2897_v27  ;;  %v2984_v27 = vld [vmem:[#allocation8 + $0x180] ss:$12 sps:$4 sm:$0xff]  }
 0x169   :  { %1424 = vmatmul.mubr.bf16.gmra.mxu0 %v832_v25  ;;  %2094 = vmatpush1.bf16.msra.mxu1 %v2960_v7  ;;  %v2980_v25 = vld [vmem:[#allocation8 + $0x198] ss:$12 sps:$4 sm:$0xff]  }
 0x16a   :  { %2572 = vmatpush3.bf16.msra.mxu0 %v2898_v28  ;;  %1464 = vmatprep.mubr.bf16.mxu0 %v3198_v46  ;;  %v2918_v46 = vld [vmem:[#allocation8 + $0x60] ss:$12 sps:$4 sm:$0xff]   ;;  %v2988_v28 = vld [vmem:[#allocation8 + $0x170] ss:$12 sps:$4 sm:$0xff]  }
 0x16b   :  { %2573 = vmatprep.subr.bf16.mxu0 %v2899_v29  ;;  %2095 = vmatprep.subr.bf16.mxu1 %v2966_v13  ;;  %v2975_v13 = vld [vmem:[#allocation8 + $0x1e8] ss:$12 sps:$4 sm:$0xff]  }
 0x16d   :  { %2096 = vmatpush1.bf16.msra.mxu1 %v2964_v12 }
 0x16e   :  { %2574 = vmatpush3.bf16.msra.mxu0 %v2900_v30  ;;  %2097 = vmatprep.subr.bf16.mxu1 %v2970_v14  ;;  %v2979_v14 = vld [vmem:[#allocation8 + $0x1d0] ss:$12 sps:$4 sm:$0xff]  }
 0x16f   :  { %2575 = vmatprep.subr.bf16.mxu0 %v2901_v31 }
 0x171   :  { %2098 = vmatpush1.bf16.msra.mxu1 %v2968_v19 }
 0x172   :  { %2576 = vmatpush3.bf16.msra.mxu0 %v2902_v32  ;;  %2099 = vmatprep.subr.bf16.mxu1 %v2974_v20 }
 0x173   :  { %2577 = vmatprep.subr.bf16.mxu0 %v2903_v33 }
 0x175   :  { %2100 = vmatpush1.bf16.msra.mxu1 %v2972_v21 }
 0x176   :  { %2578 = vmatpush3.bf16.msra.mxu0 %v2904_v34  ;;  %2101 = vmatprep.subr.bf16.mxu1 %v2978_v22 }
 0x177   :  { %2579 = vmatprep.subr.bf16.mxu0 %v2905_v35 }
 0x179   :  { %2102 = vmatpush1.bf16.msra.mxu1 %v2976_v23 }
 0x17a   :  { %2580 = vmatpush3.bf16.msra.mxu0 %v2906_v36  ;;  %2103 = vmatprep.subr.bf16.mxu1 %v2982_v24  ;;  %v2990_v24 = vld [vmem:[#allocation8 + $0x188] ss:$12 sps:$4 sm:$0xff]  }
 0x17b   :  { %2581 = vmatprep.subr.bf16.mxu0 %v2907_v37  ;;  %v929_v37 = vld [vmem:[%s3275_s4] sm:$0x7] }
 0x17c   :  { %v942_v20 = vrot.slane %v929_v37, %v3211_v63 }
 0x17d   :  { %2104 = vmatpush1.bf16.msra.mxu1 %v2980_v25 }
 0x17e   :  { %2582 = vmatpush3.bf16.msra.mxu0 %v2908_v38  ;;  %2105 = vmatprep.subr.bf16.mxu1 %v2986_v26  ;;  %v938_v38 = vrot.slane %v929_v37, %v3189_v15 }
 0x17f   :  { %2040 = vmatprep.subr.bf16.mxu0 %v2911_v39  ;;  %v934_v39 = vrot.slane %v929_v37, %v3191_v16 }
 0x181   :  { %1465 = vmatmul.mubr.bf16.vlgmr.msra.gmra.mxu0 %v3200_v48  ;;  %v2926_v48 = vld [vmem:[#allocation8 + $0x34] ss:$12 sps:$4 sm:$0xff]   ;;  %2106 = vmatpush1.bf16.msra.mxu1 %v2984_v27 }
 0x182   :  { %1472 = vmatprep.mubr.bf16.mxu0 %v3204_v55  ;;  %2041 = vmatpush1.bf16.msra.mxu0 %v2909_v40  ;;  %v2930_v55 = vld [vmem:[#allocation8] ss:$12 sps:$4 sm:$0xff]  }
 0x183   :  { %2042 = vmatprep.subr.bf16.mxu0 %v2914_v41  ;;  %2605 = vmatprep.subr.bf16.mxu1 %v2988_v28 }
 0x186   :  { %2043 = vmatpush1.bf16.msra.mxu0 %v2912_v42 }
 0x187   :  { %2044 = vmatprep.subr.bf16.mxu0 %v2917_v43 }
 0x189   :  { %1473 = vmatmul.mubr.bf16.gmra.mxu0 %v3208_v59  ;;  %v2936_v59 = vld [vmem:[#allocation8 + $0x150] ss:$12 sps:$4 sm:$0xff]  }
 0x18a   :  { %2045 = vmatpush1.bf16.msra.mxu0 %v2915_v44 }
 0x18b   :  { %2046 = vmatprep.subr.bf16.mxu0 %v2920_v45 }
 0x18e   :  { %2047 = vmatpush1.bf16.msra.mxu0 %v2918_v46 }
 0x18f   :  { %2048 = vmatprep.subr.bf16.mxu0 %v2923_v47 }
 0x192   :  { %2049 = vmatpush1.bf16.msra.mxu0 %v2921_v49 }
 0x193   :  { %2050 = vmatprep.subr.bf16.mxu0 %v2926_v48 }
 0x196   :  { %2051 = vmatpush1.bf16.msra.mxu0 %v2924_v50 }
 0x197   :  { %2052 = vmatprep.subr.bf16.mxu0 %v2929_v51 }
 0x19a   :  { %2053 = vmatpush1.bf16.msra.mxu0 %v2927_v53 }
 0x19b   :  { %2054 = vmatprep.subr.bf16.mxu0 %v2932_v54 }
 0x19e   :  { %2055 = vmatpush1.bf16.msra.mxu0 %v2930_v55 }
 0x19f   :  { %2056 = vmatprep.subr.bf16.mxu0 %v2935_v56 }
 0x1a2   :  { %2057 = vmatpush2.bf16.msra.mxu0 %v2933_v57 }
 0x1a3   :  { %2058 = vmatprep.subr.bf16.mxu0 %v2938_v58 }
 0x1a6   :  { %2059 = vmatpush2.bf16.msra.mxu0 %v2936_v59 }
 0x1a7   :  { %2060 = vmatprep.subr.bf16.mxu0 %v2941_v60 }
 0x1aa   :  { %2061 = vmatpush2.bf16.msra.mxu0 %v2939_v61 }
 0x1ab   :  { %2062 = vmatprep.subr.bf16.mxu0 %v2944_v62 }
 0x1ae   :  { %2063 = vmatpush2.bf16.msra.mxu0 %v2942_v52 }
 0x1af   :  { %2064 = vmatprep.subr.bf16.mxu0 %v2947_v0 }
 0x1b2   :  { %2065 = vmatpush2.bf16.msra.mxu0 %v2945_v2 }
 0x1b3   :  { %2066 = vmatprep.subr.bf16.mxu0 %v2950_v3 }
 0x1b6   :  { %2067 = vmatpush2.bf16.msra.mxu0 %v2948_v6  ;;  %v2967_v6 = vld [vmem:[#allocation8 + $0x218] ss:$12 sps:$4 sm:$0xff]  }
 0x1b7   :  { %2068 = vmatprep.subr.bf16.mxu0 %v2953_v9 }
 0x1ba   :  { %2069 = vmatpush2.bf16.msra.mxu0 %v2951_v10 }
 0x1bb   :  { %2070 = vmatprep.subr.bf16.mxu0 %v2956_v11  ;;  %v2971_v11 = vld [vmem:[#allocation8 + $0x200] ss:$12 sps:$4 sm:$0xff]  }
 0x1be   :  { %2071 = vmatpush2.bf16.msra.mxu0 %v2954_v18  ;;  %v2983_v18 = vld [vmem:[#allocation8 + $0x1b8] ss:$12 sps:$4 sm:$0xff]  }
 0x1bf   :  { %2683 = vmatprep.subr.bf16.mxu0 %v3220_v17 }
 0x204   :  { %v1364_v29 = vpop.f32.mrf.mxu1 }
 0x205   :  { %v1365_v45 = vadd.f32 %v1364_v29, %v934_v39 }
 0x206   :  { %v1366_v30 = vpop.f32.mrf.mxu1 }
 0x207   :  { %v1367_v42 = vadd.f32 %v1366_v30, %v938_v38 }
 0x208   :  { %v1368_v31 = vpop.f32.mrf.mxu1 }
 0x209   :  { %v1369_v43 = vadd.f32 %v1368_v31, %v934_v39 }
 0x20a   :  { %v1370_v32 = vpop.f32.mrf.mxu1 }
 0x20b   :  { %v1371_v47 = vadd.f32 %v1370_v32, %v938_v38 }
 0x20c   :  { %v1374_v33 = vpop.f32.mrf.mxu1 }
 0x20d   :  { %v1375_v61 = vadd.f32 %v1374_v33, %v934_v39 }
 0x20e   :  { %v1376_v34 = vpop.f32.mrf.mxu1 }
 0x20f   :  { %v1377_v58 = vadd.f32 %v1376_v34, %v938_v38 }
 0x210   :  { %v1378_v35 = vpop.f32.mrf.mxu1 }
 0x212   :  { %v1379_v36 = vpop.f32.mrf.mxu1 }
 0x221   :  { %v1415_v40 = vpop.f32.mrf.mxu0 }
 0x222   :  { %v1416_v51 = vadd.f32 %v1415_v40, %v1365_v45  ;;  %v2989_v40 = vld [vmem:[#allocation8 + $0xb0] ss:$12 sps:$4 sm:$0xff]  }
 0x223   :  { %v1417_v41 = vpop.f32.mrf.mxu0 }
 0x224   :  { %v3228_v44 = vpop.f32.mrf.mxu1  ;;  %v1418_v49 = vadd.f32 %v1417_v41, %v1367_v42  ;;  %v1528_v62 = vmax.f32 %v1416_v51, 0.0  ;;  %v2997_v51 = vld [vmem:[#allocation8 + $0x110] ss:$12 sps:$4 sm:$0xff]  }
 0x225   :  { %v1419_v46 = vpop.f32.mrf.mxu0 }
 0x226   :  { %v1420_v48 = vadd.f32 %v1419_v46, %v1369_v43  ;;  %v1514_v50 = vpop.f32.mrf.mxu1  ;;  %v1529_v59 = vmax.f32 %v1418_v49, 0.0  ;;  %v2991_v43 = vld [vmem:[#allocation8 + $0x158] ss:$12 sps:$4 sm:$0xff]   ;;  %v2993_v49 = vld [vmem:[#allocation8 + $0x140] ss:$12 sps:$4 sm:$0xff]  }
 0x227   :  { %v1421_v53 = vpop.f32.mrf.mxu0  ;;  %v2992_v46 = vld [vmem:[#allocation8 + $0x98] ss:$12 sps:$4 sm:$0xff]  }
 0x228   :  { %v1422_v54 = vadd.f32 %v1421_v53, %v1371_v47  ;;  %v2682_v55 = vpop.f32.mrf.mxu1  ;;  %v1531_v56 = vmax.f32 %v1420_v48, 0.0  ;;  %v2994_v48 = vld [vmem:[#allocation8 + $0x80] ss:$12 sps:$4 sm:$0xff]   ;;  %v2998_v53 = vld [vmem:[#allocation8 + $0x50] ss:$12 sps:$4 sm:$0xff]  }
 0x229   :  { %v1425_v57 = vpop.f32.mrf.mxu0  ;;  %v3001_v55 = vld [vmem:[#allocation8 + $0xe0] ss:$12 sps:$4 sm:$0xff]  }
 0x22a   :  { %v1532_v60 = vmax.f32 %v1422_v54, 0.0  ;;  %v3232_v3 = vpack.c.bf16 %v1531_v56, %v1528_v62  ;;  %v1426_v4 = vadd.f32 %v1425_v57, %v1375_v61  ;;  %v1517_v31 = vpop.f32.mrf.mxu1  ;;  %v2999_v54 = vld [vmem:[#allocation8 + $0xf8] ss:$12 sps:$4 sm:$0xff]   ;;  %v3002_v56 = vld [vmem:[#allocation8 + $0x20] ss:$12 sps:$4 sm:$0xff]  }
 0x22b   :  { %v1427_v52 = vpop.f32.mrf.mxu0  ;;  %v3003_v57 = vld [vmem:[#allocation8 + $0xc8] ss:$12 sps:$4 sm:$0xff]  }
 0x22c   :  { %v3230_v0 = vpack.c.bf16 %v1532_v60, %v1529_v59  ;;  %v1428_v2 = vadd.f32 %v1427_v52, %v1377_v58  ;;  %v1534_v10 = vmax.f32 %v1426_v4, 0.0  ;;  %v3004_v58 = vld [vmem:[#allocation8 + $0x8] ss:$12 sps:$4 sm:$0xff]  }
 0x22d   :  { %v1429_v5 = vpop.f32.mrf.mxu0 }
 0x22e   :  { %v1535_v7 = vmax.f32 %v1428_v2, 0.0  ;;  %2072 = vmatprep.mubr.bf16.mxu0 %v3230_v0  ;;  %v3240_v12 = vpack.c.bf16 %v1534_v10, %v1534_v10  ;;  %v1639_v5 = vld [vmem:[%s3277_s6] sm:$0x7] }
 0x22f   :  { %v1430_v8 = vpop.f32.mrf.mxu0  ;;  %2073 = vmatmul.mubr.bf16.vlgmr.msra.gmra.mxu0 %v3232_v3 }
 0x230   :  { %v3236_v9 = vpack.c.bf16 %v1535_v7, %v1535_v7  ;;  %2684 = vmatpush3.bf16.msra.mxu0 %v3220_v17  ;;  %v2987_v17 = vld [vmem:[#allocation8 + $0x1a0] ss:$12 sps:$4 sm:$0xff]   ;;  %v2247_v8 = vld [vmem:[%s3278_s7] sm:$0x7] }
 0x231   :  { %2685 = vmatprep.subr.bf16.mxu0 %v2967_v6 }
 0x232   :  { %2082 = vmatprep.mubr.bf16.mxu0 %v3236_v9 }
 0x234   :  { %2686 = vmatpush3.bf16.msra.mxu0 %v2967_v6  ;;  %v1644_v6 = vrot.slane %v1639_v5, %v3191_v16 }
 0x235   :  { %2687 = vmatprep.subr.bf16.mxu0 %v2971_v11 }
 0x237   :  { %2083 = vmatmul.mubr.bf16.gmra.mxu0 %v3240_v12 }
 0x238   :  { %2688 = vmatpush3.bf16.msra.mxu0 %v2971_v11 }
 0x239   :  { %2689 = vmatprep.subr.bf16.mxu0 %v2975_v13 }
 0x23c   :  { %2690 = vmatpush3.bf16.msra.mxu0 %v2975_v13 }
 0x23d   :  { %2691 = vmatprep.subr.bf16.mxu0 %v2979_v14 }
 0x240   :  { %2692 = vmatpush3.bf16.msra.mxu0 %v2979_v14 }
 0x241   :  { %v2583_v19 = vpop.f32.mrf.mxu0  ;;  %2693 = vmatprep.subr.bf16.mxu0 %v2983_v18 }
 0x243   :  { %v2584_v21 = vpop.f32.mrf.mxu0 }
 0x244   :  { %v2585_v22 = vadd.f32 %v2584_v21, %v2583_v19  ;;  %2694 = vmatpush3.bf16.msra.mxu0 %v2983_v18 }
 0x245   :  { %v2586_v23 = vpop.f32.mrf.mxu0  ;;  %2695 = vmatprep.subr.bf16.mxu0 %v2987_v17 }
 0x246   :  { %v1467_v25 = vadd.f32 %v2585_v22, %v942_v20 }
 0x247   :  { %v2587_v26 = vpop.f32.mrf.mxu0 }
 0x248   :  { %v2588_v27 = vadd.f32 %v2587_v26, %v2586_v23  ;;  %2696 = vmatpush3.bf16.msra.mxu0 %v2987_v17  ;;  %v1515_v29 = vadd.f32 %v1514_v50, %v1467_v25  ;;  %v2995_v50 = vld [vmem:[#allocation8 + $0x128] ss:$12 sps:$4 sm:$0xff]   ;;  %v2256_v17 = vrot.slane %v2247_v8, %v3189_v15 }
 0x249   :  { %v2589_v28 = vpop.f32.mrf.mxu0  ;;  %2697 = vmatprep.subr.bf16.mxu0 %v2990_v24 }
 0x24a   :  { %v1470_v30 = vadd.f32 %v2588_v27, %v942_v20  ;;  %v1530_v36 = vmax.f32 %v1515_v29, 0.0 }
 0x24b   :  { %v2590_v32 = vpop.f32.mrf.mxu0 }
 0x24c   :  { %v1518_v33 = vadd.f32 %v1517_v31, %v1470_v30  ;;  %v2591_v34 = vadd.f32 %v2590_v32, %v2589_v28  ;;  %2698 = vmatpush3.bf16.msra.mxu0 %v2990_v24 }
 0x24d   :  { %v2592_v35 = vpop.f32.mrf.mxu0 }
 0x24e   :  { %v1533_v37 = vmax.f32 %v1518_v33, 0.0  ;;  %v1475_v38 = vadd.f32 %v2591_v34, %v942_v20 }
 0x24f   :  { %v2593_v39 = vpop.f32.mrf.mxu0 }
 0x250   :  { %v1539_v41 = vpack.c.bf16 %v1533_v37, %v1530_v36  ;;  %v1523_v42 = vadd.f32 %v3228_v44, %v1475_v38  ;;  %v2996_v44 = vld [vmem:[#allocation8 + $0x68] ss:$12 sps:$4 sm:$0xff]  }
 0x252   :  { %v1536_v45 = vmax.f32 %v1523_v42, 0.0  ;;  %2124 = vmatmul.mubr.bf16.vlgmr.msra.gmra.mxu1 %v1539_v41  ;;  %2699 = vmatprep.mubr.bf16.mxu0 %v1539_v41 }
 0x253   :  { %2606 = vmatpush3.bf16.msra.mxu1 %v2989_v40  ;;  %2133 = vmatprep.mubr.bf16.mxu1 %v3097_v1  ;;  %v3000_v1 = vld [vmem:[#allocation8 + $0x38] ss:$12 sps:$4 sm:$0xff]  }
 0x254   :  { %v1542_v47 = vpack.c.bf16 %v1536_v45, %v1536_v45  ;;  %2607 = vmatprep.subr.bf16.mxu1 %v2991_v43 }
 0x256   :  { %2700 = vmatmul.mubr.bf16.vlgmr.msra.gmra.mxu0 %v1542_v47 }
 0x257   :  { %2608 = vmatpush3.bf16.msra.mxu1 %v2992_v46 }
 0x258   :  { %2609 = vmatprep.subr.bf16.mxu1 %v2993_v49 }
 0x25a   :  { %2134 = vmatmul.mubr.bf16.gmra.mxu1 %v1542_v47 }
 0x25b   :  { %2610 = vmatpush3.bf16.msra.mxu1 %v2994_v48  ;;  %2174 = vmatprep.mubr.bf16.mxu1 %v3230_v0 }
 0x25c   :  { %2611 = vmatprep.subr.bf16.mxu1 %v2995_v50  ;;  %v1652_v50 = vrot.slane %v1639_v5, %v3211_v63 }
 0x25f   :  { %2612 = vmatpush3.bf16.msra.mxu1 %v2996_v44 }
 0x260   :  { %2613 = vmatprep.subr.bf16.mxu1 %v2997_v51 }
 0x263   :  { %2614 = vmatpush3.bf16.msra.mxu1 %v2998_v53 }
 0x264   :  { %2615 = vmatprep.subr.bf16.mxu1 %v2999_v54 }
 0x267   :  { %2616 = vmatpush3.bf16.msra.mxu1 %v3000_v1 }
 0x268   :  { %2617 = vmatprep.subr.bf16.mxu1 %v3001_v55 }
 0x26b   :  { %2618 = vmatpush3.bf16.msra.mxu1 %v3002_v56 }
 0x26c   :  { %2619 = vmatprep.subr.bf16.mxu1 %v3003_v57  ;;  %v2260_v57 = vrot.slane %v2247_v8, %v3211_v63 }
 0x26f   :  { %2620 = vmatpush3.bf16.msra.mxu1 %v3004_v58 }
 0x272   :  { %2175 = vmatmul.mubr.bf16.vlgmr.msra.gmra.mxu1 %v3232_v3  ;;  %v1648_v3 = vrot.slane %v1639_v5, %v3189_v15 }
 0x273   :  { %2182 = vmatprep.mubr.bf16.mxu1 %v3236_v9 }
 0x27a   :  { %2183 = vmatmul.mubr.bf16.gmra.mxu1 %v3240_v12  ;;  %v2252_v12 = vrot.slane %v2247_v8, %v3191_v16 }
 0x2ef   :  { %v2074_v59 = vpop.f32.mrf.mxu0 }
 0x2f0   :  { %v2075_v7 = vadd.f32 %v2074_v59, %v1644_v6 }
 0x2f1   :  { %v2076_v60 = vpop.f32.mrf.mxu0 }
 0x2f2   :  { %v2077_v10 = vadd.f32 %v2076_v60, %v1648_v3 }
 0x2f3   :  { %v2078_v61 = vpop.f32.mrf.mxu0 }
 0x2f4   :  { %v2079_v14 = vadd.f32 %v2078_v61, %v1644_v6 }
 0x2f5   :  { %v2080_v62 = vpop.f32.mrf.mxu0 }
 0x2f6   :  { %v2081_v22 = vadd.f32 %v2080_v62, %v1648_v3 }
 0x2f7   :  { %v2084_v52 = vpop.f32.mrf.mxu0 }
 0x2f8   :  { %v2085_v25 = vadd.f32 %v2084_v52, %v1644_v6 }
 0x2f9   :  { %v2086_v0 = vpop.f32.mrf.mxu0 }
 0x2fa   :  { %v2087_v33 = vadd.f32 %v2086_v0, %v1648_v3 }
 0x2fb   :  { %v2088_v2 = vpop.f32.mrf.mxu0 }
 0x2fd   :  { %v2089_v4 = vpop.f32.mrf.mxu0 }
 0x312   :  { %v2125_v9 = vpop.f32.mrf.mxu1 }
 0x313   :  { %v2126_v11 = vadd.f32 %v2125_v9, %v2075_v7 }
 0x314   :  { %v2127_v13 = vpop.f32.mrf.mxu1 }
 0x315   :  { %v2238_v18 = vmax.f32 %v2126_v11, 0.0  ;;  %v2128_v19 = vadd.f32 %v2127_v13, %v2077_v10  ;;  %v2528_v13 = vld [vmem:[#allocation2] ss:$0 sm:$0xff] }
 0x316   :  { %v2129_v20 = vpop.f32.mrf.mxu1  ;;  %v2701_v21 = vpop.f32.mrf.mxu0 }
 0x317   :  { %v2239_v23 = vmax.f32 %v2128_v19, 0.0  ;;  %v2130_v24 = vadd.f32 %v2129_v20, %v2079_v14  ;;  %v2264_v28 = vmul.f32 %v2252_v12, %v2238_v18 }
 0x318   :  { %v2131_v26 = vpop.f32.mrf.mxu1  ;;  %v2224_v27 = vpop.f32.mrf.mxu0 }
 0x319   :  { %v2265_v29 = vmul.f32 %v2256_v17, %v2239_v23  ;;  %v2241_v30 = vmax.f32 %v2130_v24, 0.0  ;;  %v2132_v31 = vadd.f32 %v2131_v26, %v2081_v22 }
 0x31a   :  { %v2135_v32 = vpop.f32.mrf.mxu1  ;;  %v2702_v16 = vpop.f32.mrf.mxu0 }
 0x31b   :  { %v2242_v34 = vmax.f32 %v2132_v31, 0.0  ;;  %v2136_v35 = vadd.f32 %v2135_v32, %v2085_v25  ;;  %v2273_v36 = vadd.f32 %v2265_v29, %v2264_v28  ;;  %v2267_v15 = vmul.f32 %v2252_v12, %v2241_v30 }
 0x31c   :  { %v2137_v37 = vpop.f32.mrf.mxu1  ;;  %v2227_v61 = vpop.f32.mrf.mxu0 }
 0x31d   :  { %v2268_v38 = vmul.f32 %v2256_v17, %v2242_v34  ;;  %v2244_v39 = vmax.f32 %v2136_v35, 0.0  ;;  %v2138_v40 = vadd.f32 %v2137_v37, %v2087_v33 }
 0x31e   :  { %v2139_v41 = vpop.f32.mrf.mxu1 }
 0x31f   :  { %v2245_v42 = vmax.f32 %v2138_v40, 0.0  ;;  %v2277_v43 = vadd.f32 %v2268_v38, %v2267_v15  ;;  %v2270_v46 = vmul.f32 %v2252_v12, %v2244_v39 }
 0x320   :  { %v2140_v45 = vpop.f32.mrf.mxu1 }
 0x321   :  { %v2271_v47 = vmul.f32 %v2256_v17, %v2245_v42 }
 0x323   :  { %v2281_v49 = vadd.f32 %v2271_v47, %v2270_v46 }
 0x332   :  { %v2621_v48 = vpop.f32.mrf.mxu1 }
 0x334   :  { %v2622_v44 = vpop.f32.mrf.mxu1 }
 0x335   :  { %v2623_v51 = vadd.f32 %v2622_v44, %v2621_v48 }
 0x336   :  { %v2624_v53 = vpop.f32.mrf.mxu1 }
 0x337   :  { %v2177_v54 = vadd.f32 %v2623_v51, %v1652_v50 }
 0x338   :  { %v2625_v1 = vpop.f32.mrf.mxu1 }
 0x339   :  { %v2626_v55 = vadd.f32 %v2625_v1, %v2624_v53  ;;  %v2225_v56 = vadd.f32 %v2224_v27, %v2177_v54 }
 0x33a   :  { %v2627_v58 = vpop.f32.mrf.mxu1 }
 0x33b   :  { %v2180_v59 = vadd.f32 %v2626_v55, %v1652_v50  ;;  %v2240_v60 = vmax.f32 %v2225_v56, 0.0 }
 0x33c   :  { %v2628_v62 = vpop.f32.mrf.mxu1 }
 0x33d   :  { %v2228_v52 = vadd.f32 %v2227_v61, %v2180_v59  ;;  %v2629_v0 = vadd.f32 %v2628_v62, %v2627_v58  ;;  %v2266_v2 = vmul.f32 %v2260_v57, %v2240_v60 }
 0x33e   :  { %v2630_v4 = vpop.f32.mrf.mxu1 }
 0x33f   :  { %v2243_v6 = vmax.f32 %v2228_v52, 0.0  ;;  %v2185_v5 = vadd.f32 %v2629_v0, %v1652_v50  ;;  %v2274_v3 = vadd.f32 %v2273_v36, %v2266_v2 }
 0x340   :  { %v2631_v7 = vpop.f32.mrf.mxu1 }
 0x341   :  { %2275 = vadd.xlane.f32.xlu0 %v2274_v3  ;;  %v2269_v9 = vmul.f32 %v2260_v57, %v2243_v6  ;;  %v2233_v10 = vadd.f32 %v2701_v21, %v2185_v5 }
 0x343   :  { %v2278_v11 = vadd.f32 %v2277_v43, %v2269_v9  ;;  %v2246_v12 = vmax.f32 %v2233_v10, 0.0 }
 0x345   :  { %2279 = vadd.xlane.f32.xlu0 %v2278_v11  ;;  %v2272_v63 = vmul.f32 %v2260_v57, %v2246_v12 }
 0x347   :  { %v2282_v8 = vadd.f32 %v2281_v49, %v2272_v63 }
 0x349   :  { %2283 = vadd.xlane.f32.xlu1 %v2282_v8 }
 0x3ca   :  { %v2276_v14 = vpop.xlane.xlu0 %2275 }
 0x3cb   :  { %v2292_v18 = vadd.f32 %v2528_v13, %v2276_v14 }
 0x3cd   :  { %2296 = vst.msk [vmem:[%s3280_s9] sm:$0xff] %vm2295_vm0, %v2292_v18 }
 0x3ce   :  { %v2280_v19 = vpop.xlane.xlu0 %2279 }
 0x3cf   :  { %v2293_v17 = vadd.f32 %v2528_v13, %v2280_v19 }
 0x3d1   :  { %2297 = vst.msk [vmem:[%s3280_s9 + $0x8] sm:$0xff] %vm2295_vm0, %v2293_v17 }
 0x3d2   :  { %v2284_v20 = vpop.xlane.xlu1 %2283 }
 0x3d3   :  { %v2294_v21 = vadd.f32 %v2528_v13, %v2284_v20 }
 0x3d5   :  { %2298 = vst.msk [vmem:[%s3280_s9 + $0x10] sm:$0xff] %vm2295_vm0, %v2294_v21 }
 0x3d6   :  { %2303 = vsyncpa [#allocation4], 1 }
 0x3d7   :  { %2304 = vsyncpa [#allocation6], 1 }
 0x3d8   :  { %2305 = vsyncpa [#allocation9], 1 }

</bundles_post_ra>
